<compile_context>
chip_gen: v7x
topology: tpu7x:2x2x1
jax: 0.10.0
libtpu: 0.0.40
codegen_flags: <defaults>
</compile_context>

<pallas_src>
import functools

import jax
import jax.numpy as jnp
from jax.experimental import pallas as pl
from jax.experimental.pallas import tpu as pltpu


# ----------------------------------------------------------------------------
# Pallas kernel
# ----------------------------------------------------------------------------
def attention_kernel(x_ref, mrow_ref, mcol_ref, wqkv_ref, wout_ref, bout_ref,
                     wconv_ref, o_ref, acc_ref, *, heads, dim_head):
    Bb, N, D = x_ref.shape
    inner = heads * dim_head
    neg = -float(jnp.finfo(jnp.float32).max)          # torch max_neg_value

    # ---- single lane-dense QKV matmul (softmax scale pre-folded into Q cols) ----
    x2 = x_ref[...].reshape(Bb * N, D).astype(jnp.bfloat16)
    qkv = jnp.dot(x2, wqkv_ref[...], preferred_element_type=jnp.float32)
    qkv = qkv.reshape(Bb, N, 3 * inner)               # (Bb, N, 3*inner) f32

    qkv_b = qkv.astype(jnp.bfloat16)                  # ONE hoisted full-width convert
    v_f32 = qkv[:, :, 2 * inner:]                     # f32 V kept only for the conv

    # ---- key mask, hoisted out of the head loop ----
    key_keep = mrow_ref[...] > 0.0                    # (Bb, 1, N) bool

    # ---- per-head masked attention, deferred softmax normalization ----
    for h in range(heads):
        lo = h * dim_head
        q = qkv_b[:, :, lo:lo + dim_head]                         # (Bb, N, dh)
        k = qkv_b[:, :, inner + lo:inner + lo + dim_head]
        v = qkv_b[:, :, 2 * inner + lo:2 * inner + lo + dim_head]

        dots = jnp.einsum('bid,bjd->bij', q, k,
                          preferred_element_type=jnp.float32)     # (Bb, N, N)
        dots = jnp.where(key_keep, dots, neg)                     # masked_fill(~mask)

        m = jnp.max(dots, axis=-1, keepdims=True)
        p = jnp.exp(dots - m)                                     # unnormalized probs
        r = jnp.sum(p, axis=-1, keepdims=True)                    # (Bb, N, 1)

        o_h = jnp.einsum('bij,bjd->bid', p.astype(jnp.bfloat16), v,
                         preferred_element_type=jnp.float32)      # (Bb, N, dh)
        # normalize the small (N, dh) result instead of the (N, N) matrix; EUP recip
        acc_ref[:, :, lo:lo + dim_head] = o_h * pl.reciprocal(r, approx=True)

    # ---- depthwise residual conv along the sequence axis (no padded buffer) ----
    # acc[b, i, c] += sum_t conv_w[head(c), t] * v[b, i + t - pad, c]
    wtaps = wconv_ref[...]                             # (K, inner) f32 head-major rows
    K = wconv_ref.shape[0]
    pad = K // 2
    for t in range(K):
        s0, s1 = max(0, t - pad), min(N, N + t - pad)  # clamped source rows of V
        d0, d1 = max(0, pad - t), min(N, N + pad - t)  # matching destination rows
        if s1 <= s0:
            continue                                   # tap never overlaps real data
        acc_ref[:, d0:d1, :] += wtaps[t, :] * v_f32[:, s0:s1, :]

    # ---- merged output projection over all heads (single K=inner matmul) ----
    out2 = acc_ref[...].reshape(Bb * N, inner).astype(jnp.bfloat16)
    proj = jnp.dot(out2, wout_ref[...], preferred_element_type=jnp.float32)
    proj = proj.reshape(Bb, N, D) + bout_ref[...]

    # out.masked_fill(~mask[:, :, None], 0.0)  (where => exact zeros on masked rows)
    o_ref[...] = jnp.where(mcol_ref[...] > 0.0, proj, 0.0)


# ----------------------------------------------------------------------------
# Wrapper: block_b auto-sizing against a VMEM budget, grid over batch blocks
# ----------------------------------------------------------------------------
def _vmem_bytes_estimate(block_b, N, D, heads, dim_head, K):
    """Per-grid-step VMEM live-set estimate (bytes)."""
    inner = heads * dim_head
    f32, bf16 = 4, 2
    x_blk = block_b * N * D * f32
    o_blk = block_b * N * D * f32
    masks = block_b * (max(N, 8) * 128 + 8 * 128) * f32      # padded mask vreg tiles
    qkv = block_b * N * 3 * inner * (f32 + bf16)             # f32 result + bf16 copy
    dots = 2 * block_b * N * N * f32                         # dots + p (one head live)
    acc = block_b * N * inner * f32                          # scratch accumulator
    weights = (D * 3 * inner * bf16 + inner * D * bf16 + D * f32 + K * inner * f32)
    # blocked inputs/outputs are double-buffered by the auto-pipeline
    return 2 * (x_blk + o_blk + masks + weights) + qkv + dots + acc


def _auto_block_b(B, N, D, heads, dim_head, K,
                  target_m=256, vmem_budget=40 * 1024 * 1024):
    """Largest batch block with M = block_b*N <= target_m, >=2 grid steps (v7x
    megacore + pipeline overlap), even grid preferred, within the VMEM budget."""
    valid = []
    for cand in range(1, B + 1):
        if B % cand:
            continue
        if B > 1 and B // cand < 2:
            continue
        if cand * N > target_m:
            continue
        if _vmem_bytes_estimate(cand, N, D, heads, dim_head, K) > vmem_budget:
            continue
        valid.append(cand)
    if not valid:
        return 1
    even = [c for c in valid if (B // c) % 2 == 0]
    return max(even) if even else max(valid)


def attention_forward(x, mask, packed, *, heads, dim_head, block_b=None):
    """x: (B, N, dim) f32; mask: (B, N) float/bool (truthy == keep)."""
    B, N, D = x.shape
    inner = heads * dim_head
    K = packed["conv_rows"].shape[0]

    if block_b is None:
        block_b = _auto_block_b(B, N, D, heads, dim_head, K)
    assert B % block_b == 0

    est = _vmem_bytes_estimate(block_b, N, D, heads, dim_head, K)
    vmem_limit = int(min(max(2 * est, 32 * 1024 * 1024), 48 * 1024 * 1024))

    mrow = mask[:, None, :].astype(jnp.float32)        # key mask     (B, 1, N)
    mcol = mask[:, :, None].astype(jnp.float32)        # output mask  (B, N, 1)

    kernel = functools.partial(attention_kernel, heads=heads, dim_head=dim_head)
    return pl.pallas_call(
        kernel,
        out_shape=jax.ShapeDtypeStruct((B, N, D), jnp.float32),
        grid=(B // block_b,),
        in_specs=[
            pl.BlockSpec((block_b, N, D), lambda b: (b, 0, 0)),
            pl.BlockSpec((block_b, 1, N), lambda b: (b, 0, 0)),
            pl.BlockSpec((block_b, N, 1), lambda b: (b, 0, 0)),
            pl.BlockSpec((D, 3 * inner), lambda b: (0, 0)),    # bf16, scale folded
            pl.BlockSpec((inner, D), lambda b: (0, 0)),        # bf16
            pl.BlockSpec((1, D), lambda b: (0, 0)),            # f32 bias
            pl.BlockSpec((K, inner), lambda b: (0, 0)),        # f32 conv tap rows
        ],
        out_specs=pl.BlockSpec((block_b, N, D), lambda b: (b, 0, 0)),
        scratch_shapes=[pltpu.VMEM((block_b, N, inner), jnp.float32)],
        compiler_params=pltpu.CompilerParams(
            dimension_semantics=("parallel",),                 # megacore on v7x
            vmem_limit_bytes=vmem_limit,
        ),
    )(x, mrow, mcol, packed["w_qkv"], packed["w_out"], packed["b_out"],
      packed["conv_rows"])


# ----------------------------------------------------------------------------
# Glue: parameter init (PyTorch layout) and packing for the kernel
# ----------------------------------------------------------------------------
def init_attention_params(key, dim, heads, dim_head, res_kernel):
    """PyTorch-equivalent parameters: to_qkv (no bias), to_out (bias), res_conv."""
    inner = heads * dim_head
    k1, k2, k3, k4 = jax.random.split(key, 4)
    return dict(
        w_qkv=jax.random.normal(k1, (dim, 3 * inner), jnp.float32) * dim ** -0.5,
        w_out=jax.random.normal(k2, (inner, dim), jnp.float32) * inner ** -0.5,
        b_out=jax.random.normal(k3, (dim,), jnp.float32) * 0.02,
        conv_w=jax.random.normal(k4, (heads, res_kernel), jnp.float32) / res_kernel,
    )


def pack_attention_params(p, *, heads, dim_head):
    """Fold the softmax scale into the Q columns, cast matmul weights to bf16 and
    expand the depthwise conv taps to head-major per-lane rows (K, inner)."""
    inner = heads * dim_head
    scale = dim_head ** -0.5
    w_qkv = p["w_qkv"].at[:, :inner].multiply(scale)
    conv_rows = jnp.repeat(p["conv_w"].T, dim_head, axis=1)    # (K, heads*dim_head)
    return dict(
        w_qkv=w_qkv.astype(jnp.bfloat16),
        w_out=p["w_out"].astype(jnp.bfloat16),
        b_out=p["b_out"].reshape(1, -1).astype(jnp.float32),
        conv_rows=conv_rows.astype(jnp.float32),
    )


# ----------------------------------------------------------------------------
# Pure-JAX reference (PyTorch semantics; same bf16 casts and deferred softmax
# normalization — p@V scaled by 1/rowsum is algebraically identical to
# softmax(dots)@V, only the reciprocal is exact here vs approx in the kernel)
# ----------------------------------------------------------------------------
def attention_ref(x, mask, packed, *, heads, dim_head):
    B, N, D = x.shape
    inner = heads * dim_head
    qkv = jnp.dot(x.astype(jnp.bfloat16), packed["w_qkv"],
                  preferred_element_type=jnp.float32)          # scale already folded
    q, k, v = jnp.split(qkv, 3, axis=-1)
    to_heads = lambda t: t.reshape(B, N, heads, dim_head).transpose(0, 2, 1, 3)
    q, k, v = to_heads(q), to_heads(k), to_heads(v)            # (B, H, N, dh) f32

    dots = jnp.einsum('bhid,bhjd->bhij', q.astype(jnp.bfloat16),
                      k.astype(jnp.bfloat16), preferred_element_type=jnp.float32)
    neg = -float(jnp.finfo(jnp.float32).max)
    dots = jnp.where(mask[:, None, None, :] > 0, dots, neg)
    m = jnp.max(dots, axis=-1, keepdims=True)
    p = jnp.exp(dots - m)
    r = jnp.sum(p, axis=-1, keepdims=True)
    out = jnp.einsum('bhij,bhjd->bhid', p.astype(jnp.bfloat16),
                     v.astype(jnp.bfloat16), preferred_element_type=jnp.float32) / r

    # depthwise residual conv (Conv2d cross-correlation along the sequence axis)
    K = packed["conv_rows"].shape[0]
    pad = K // 2
    conv_w = packed["conv_rows"][:, ::dim_head]                # (K, heads)
    vpad = jnp.pad(v, ((0, 0), (0, 0), (pad, pad), (0, 0)))
    conv = jnp.zeros_like(v)
    for t in range(K):
        conv = conv + conv_w[t][None, :, None, None] * vpad[:, :, t:t + N, :]
    out = out + conv

    out = out.transpose(0, 2, 1, 3).reshape(B, N, inner)       # 'b h n d -> b n (h d)'
    out = jnp.dot(out.astype(jnp.bfloat16), packed["w_out"],
                  preferred_element_type=jnp.float32) + packed["b_out"]
    return jnp.where(mask[:, :, None] > 0, out, 0.0)


# ----------------------------------------------------------------------------
if __name__ == "__main__":
    DIM, HEADS, DIM_HEAD = 128, 4, 32       # lane-dense: dim == heads*dim_head == 128
    RES_KERNEL = 33
    N = 8

    key = jax.random.PRNGKey(0)
    kp, kx1, kx2 = jax.random.split(key, 3)
    torch_params = init_attention_params(kp, DIM, HEADS, DIM_HEAD, RES_KERNEL)
    packed = pack_attention_params(torch_params, heads=HEADS, dim_head=DIM_HEAD)

    def run_check(B, kx):
        x = jax.random.normal(kx, (B, N, DIM), jnp.float32)
        # deterministic variable-length keep mask (>=1 valid key per sequence)
        lengths = 1 + (jnp.arange(B) % N)
        mask = (jnp.arange(N)[None, :] < lengths[:, None]).astype(jnp.float32)

        out = attention_forward(x, mask, packed, heads=HEADS, dim_head=DIM_HEAD)
        jax.block_until_ready(out)
        assert out.shape == (B, N, DIM)

        ref = attention_ref(x, mask, packed, heads=HEADS, dim_head=DIM_HEAD)
        err = float(jnp.max(jnp.abs(out - ref)))
        assert jnp.allclose(out, ref, atol=2e-2, rtol=2e-2), (B, err)

    run_check(2, kx1)    # tiny demo shape  (block_b=1, grid=2)
    run_check(32, kx2)   # blocked path     (block_b=16 -> M=128 per matmul, grid=2)

    print("KERNEL_OK")
</pallas_src>

<mosaic_0001>
module attributes {stable_mosaic.version = 11 : i64} {
  func.func @attention_kernel(%arg0: i32, %arg1: memref<1x8x128xf32, #tpu.memory_space<vmem>>, %arg2: memref<1x1x8xf32, #tpu.memory_space<vmem>>, %arg3: memref<1x8x1xf32, #tpu.memory_space<vmem>>, %arg4: memref<128x384xbf16, #tpu.memory_space<vmem>>, %arg5: memref<128x128xbf16, #tpu.memory_space<vmem>>, %arg6: memref<1x128xf32, #tpu.memory_space<vmem>>, %arg7: memref<33x128xf32, #tpu.memory_space<vmem>>, %arg8: memref<1x8x128xf32, #tpu.memory_space<vmem>>, %arg9: memref<1x8x128xf32, #tpu.memory_space<vmem>>) attributes {dimension_semantics = [#tpu.dimension_semantics<parallel>], iteration_bounds = array<i64: 2>, scalar_prefetch = 0 : i64, scratch_operands = 1 : i64, tpu.core_type = #tpu.core_type<tc>, window_params = [{transform_indices = @transform_0, window_bounds = array<i64: 1, 8, 128>}, {transform_indices = @transform_1, window_bounds = array<i64: 1, 1, 8>}, {transform_indices = @transform_2, window_bounds = array<i64: 1, 8, 1>}, {pipeline_mode = #tpu.pipeline_mode<synchronous>, transform_indices = @transform_3, window_bounds = array<i64: 128, 384>}, {pipeline_mode = #tpu.pipeline_mode<synchronous>, transform_indices = @transform_4, window_bounds = array<i64: 128, 128>}, {pipeline_mode = #tpu.pipeline_mode<synchronous>, transform_indices = @transform_5, window_bounds = array<i64: 1, 128>}, {pipeline_mode = #tpu.pipeline_mode<synchronous>, transform_indices = @transform_6, window_bounds = array<i64: 33, 128>}, {transform_indices = @transform_7, window_bounds = array<i64: 1, 8, 128>}]} {
    %c0 = arith.constant 0 : index
    %c0_0 = arith.constant 0 : index
    %c0_1 = arith.constant 0 : index
    %0 = vector.load %arg1[%c0, %c0_0, %c0_1] : memref<1x8x128xf32, #tpu.memory_space<vmem>>, vector<1x8x128xf32>
    %1 = vector.shape_cast %0 : vector<1x8x128xf32> to vector<8x128xf32>
    %2 = arith.truncf %1 : vector<8x128xf32> to vector<8x128xbf16>
    %c0_2 = arith.constant 0 : index
    %c0_3 = arith.constant 0 : index
    %3 = vector.load %arg4[%c0_2, %c0_3] : memref<128x384xbf16, #tpu.memory_space<vmem>>, vector<128x384xbf16>
    %cst = arith.constant dense<0.000000e+00> : vector<8x384xf32>
    %4 = tpu.matmul %2, %3, %cst {dimension_numbers = #tpu.dot_dimension_numbers<[1], [0], [0], [1], [0, 0, 1, 1], [], []>} : vector<8x128xbf16>, vector<128x384xbf16>, vector<8x384xf32> -> vector<8x384xf32>
    %5 = vector.shape_cast %4 : vector<8x384xf32> to vector<1x8x384xf32>
    %6 = arith.truncf %5 : vector<1x8x384xf32> to vector<1x8x384xbf16>
    %7 = vector.extract_strided_slice %5 {offsets = [0, 0, 256], sizes = [1, 8, 128], strides = [1, 1, 1]} : vector<1x8x384xf32> to vector<1x8x128xf32>
    %c0_4 = arith.constant 0 : index
    %c0_5 = arith.constant 0 : index
    %c0_6 = arith.constant 0 : index
    %8 = vector.load %arg2[%c0_4, %c0_5, %c0_6] : memref<1x1x8xf32, #tpu.memory_space<vmem>>, vector<1x1x8xf32>
    %cst_7 = arith.constant 0.000000e+00 : f32
    %9 = vector.broadcast %cst_7 : f32 to vector<1x1x8xf32>
    %10 = arith.cmpf ogt, %8, %9 : vector<1x1x8xf32>
    %11 = vector.extract_strided_slice %6 {offsets = [0, 0, 0], sizes = [1, 8, 32], strides = [1, 1, 1]} : vector<1x8x384xbf16> to vector<1x8x32xbf16>
    %12 = vector.extract_strided_slice %6 {offsets = [0, 0, 128], sizes = [1, 8, 32], strides = [1, 1, 1]} : vector<1x8x384xbf16> to vector<1x8x32xbf16>
    %13 = vector.extract_strided_slice %6 {offsets = [0, 0, 256], sizes = [1, 8, 32], strides = [1, 1, 1]} : vector<1x8x384xbf16> to vector<1x8x32xbf16>
    "tpu.trace_start"() <{level = 10 : i32, message = "bid,bjd->bij"}> : () -> ()
    %cst_8 = arith.constant dense<0.000000e+00> : vector<1x8x8xf32>
    %14 = tpu.matmul %11, %12, %cst_8 {dimension_numbers = #tpu.dot_dimension_numbers<[2], [2], [1], [1], [0, 0, 0, 1, 1, 1], [0], [0]>} : vector<1x8x32xbf16>, vector<1x8x32xbf16>, vector<1x8x8xf32> -> vector<1x8x8xf32>
    %cst_9 = arith.constant -3.40282347E+38 : f32
    "tpu.trace_stop"() : () -> ()
    %15 = vector.shape_cast %10 : vector<1x1x8xi1> to vector<1x1x8xi1>
    %16 = vector.broadcast %15 : vector<1x1x8xi1> to vector<1x8x8xi1>
    %17 = vector.broadcast %cst_9 : f32 to vector<1x8x8xf32>
    %18 = arith.select %16, %14, %17 : vector<1x8x8xi1>, vector<1x8x8xf32>
    %cst_10 = arith.constant dense<0xFF800000> : vector<1x8xf32>
    %19 = vector.multi_reduction <maximumf>, %18, %cst_10 [2] : vector<1x8x8xf32> to vector<1x8xf32>
    %20 = vector.shape_cast %19 : vector<1x8xf32> to vector<1x8x1xf32>
    %21 = vector.broadcast %20 : vector<1x8x1xf32> to vector<1x8x8xf32>
    %22 = arith.subf %18, %21 : vector<1x8x8xf32>
    %23 = math.exp %22 : vector<1x8x8xf32>
    %cst_11 = arith.constant dense<0.000000e+00> : vector<1x8xf32>
    %24 = vector.multi_reduction <add>, %23, %cst_11 [2] : vector<1x8x8xf32> to vector<1x8xf32>
    %25 = vector.shape_cast %24 : vector<1x8xf32> to vector<1x8x1xf32>
    %26 = arith.truncf %23 : vector<1x8x8xf32> to vector<1x8x8xbf16>
    "tpu.trace_start"() <{level = 10 : i32, message = "bij,bjd->bid"}> : () -> ()
    %cst_12 = arith.constant dense<0.000000e+00> : vector<1x8x32xf32>
    %27 = tpu.matmul %26, %13, %cst_12 {dimension_numbers = #tpu.dot_dimension_numbers<[2], [1], [1], [2], [0, 0, 0, 1, 1, 2], [0], [0]>} : vector<1x8x8xbf16>, vector<1x8x32xbf16>, vector<1x8x32xf32> -> vector<1x8x32xf32>
    "tpu.trace_stop"() : () -> ()
    %28 = tpu.reciprocal %25 {approx = true} : vector<1x8x1xf32> -> vector<1x8x1xf32>
    %29 = vector.broadcast %28 : vector<1x8x1xf32> to vector<1x8x32xf32>
    %30 = arith.mulf %27, %29 : vector<1x8x32xf32>
    %c0_13 = arith.constant 0 : index
    %c0_14 = arith.constant 0 : index
    %c0_15 = arith.constant 0 : index
    %31 = vector.load %arg9[%c0_13, %c0_14, %c0_15] : memref<1x8x128xf32, #tpu.memory_space<vmem>>, vector<1x8x32xf32>
    tpu.vector_store %arg9[%c0_13, %c0_14, %c0_15], %30 {strides = array<i32>} : memref<1x8x128xf32, #tpu.memory_space<vmem>>, vector<1x8x32xf32>,
    %32 = vector.extract_strided_slice %6 {offsets = [0, 0, 32], sizes = [1, 8, 32], strides = [1, 1, 1]} : vector<1x8x384xbf16> to vector<1x8x32xbf16>
    %33 = vector.extract_strided_slice %6 {offsets = [0, 0, 160], sizes = [1, 8, 32], strides = [1, 1, 1]} : vector<1x8x384xbf16> to vector<1x8x32xbf16>
    %34 = vector.extract_strided_slice %6 {offsets = [0, 0, 288], sizes = [1, 8, 32], strides = [1, 1, 1]} : vector<1x8x384xbf16> to vector<1x8x32xbf16>
    "tpu.trace_start"() <{level = 10 : i32, message = "bid,bjd->bij"}> : () -> ()
    %cst_16 = arith.constant dense<0.000000e+00> : vector<1x8x8xf32>
    %35 = tpu.matmul %32, %33, %cst_16 {dimension_numbers = #tpu.dot_dimension_numbers<[2], [2], [1], [1], [0, 0, 0, 1, 1, 1], [0], [0]>} : vector<1x8x32xbf16>, vector<1x8x32xbf16>, vector<1x8x8xf32> -> vector<1x8x8xf32>
    %cst_17 = arith.constant -3.40282347E+38 : f32
    "tpu.trace_stop"() : () -> ()
    %36 = vector.shape_cast %10 : vector<1x1x8xi1> to vector<1x1x8xi1>
    %37 = vector.broadcast %36 : vector<1x1x8xi1> to vector<1x8x8xi1>
    %38 = vector.broadcast %cst_17 : f32 to vector<1x8x8xf32>
    %39 = arith.select %37, %35, %38 : vector<1x8x8xi1>, vector<1x8x8xf32>
    %cst_18 = arith.constant dense<0xFF800000> : vector<1x8xf32>
    %40 = vector.multi_reduction <maximumf>, %39, %cst_18 [2] : vector<1x8x8xf32> to vector<1x8xf32>
    %41 = vector.shape_cast %40 : vector<1x8xf32> to vector<1x8x1xf32>
    %42 = vector.broadcast %41 : vector<1x8x1xf32> to vector<1x8x8xf32>
    %43 = arith.subf %39, %42 : vector<1x8x8xf32>
    %44 = math.exp %43 : vector<1x8x8xf32>
    %cst_19 = arith.constant dense<0.000000e+00> : vector<1x8xf32>
    %45 = vector.multi_reduction <add>, %44, %cst_19 [2] : vector<1x8x8xf32> to vector<1x8xf32>
    %46 = vector.shape_cast %45 : vector<1x8xf32> to vector<1x8x1xf32>
    %47 = arith.truncf %44 : vector<1x8x8xf32> to vector<1x8x8xbf16>
    "tpu.trace_start"() <{level = 10 : i32, message = "bij,bjd->bid"}> : () -> ()
    %cst_20 = arith.constant dense<0.000000e+00> : vector<1x8x32xf32>
    %48 = tpu.matmul %47, %34, %cst_20 {dimension_numbers = #tpu.dot_dimension_numbers<[2], [1], [1], [2], [0, 0, 0, 1, 1, 2], [0], [0]>} : vector<1x8x8xbf16>, vector<1x8x32xbf16>, vector<1x8x32xf32> -> vector<1x8x32xf32>
    "tpu.trace_stop"() : () -> ()
    %49 = tpu.reciprocal %46 {approx = true} : vector<1x8x1xf32> -> vector<1x8x1xf32>
    %50 = vector.broadcast %49 : vector<1x8x1xf32> to vector<1x8x32xf32>
    %51 = arith.mulf %48, %50 : vector<1x8x32xf32>
    %c0_21 = arith.constant 0 : index
    %c0_22 = arith.constant 0 : index
    %c32 = arith.constant 32 : index
    %52 = vector.load %arg9[%c0_21, %c0_22, %c32] : memref<1x8x128xf32, #tpu.memory_space<vmem>>, vector<1x8x32xf32>
    tpu.vector_store %arg9[%c0_21, %c0_22, %c32], %51 {strides = array<i32>} : memref<1x8x128xf32, #tpu.memory_space<vmem>>, vector<1x8x32xf32>,
    %53 = vector.extract_strided_slice %6 {offsets = [0, 0, 64], sizes = [1, 8, 32], strides = [1, 1, 1]} : vector<1x8x384xbf16> to vector<1x8x32xbf16>
    %54 = vector.extract_strided_slice %6 {offsets = [0, 0, 192], sizes = [1, 8, 32], strides = [1, 1, 1]} : vector<1x8x384xbf16> to vector<1x8x32xbf16>
    %55 = vector.extract_strided_slice %6 {offsets = [0, 0, 320], sizes = [1, 8, 32], strides = [1, 1, 1]} : vector<1x8x384xbf16> to vector<1x8x32xbf16>
    "tpu.trace_start"() <{level = 10 : i32, message = "bid,bjd->bij"}> : () -> ()
    %cst_23 = arith.constant dense<0.000000e+00> : vector<1x8x8xf32>
    %56 = tpu.matmul %53, %54, %cst_23 {dimension_numbers = #tpu.dot_dimension_numbers<[2], [2], [1], [1], [0, 0, 0, 1, 1, 1], [0], [0]>} : vector<1x8x32xbf16>, vector<1x8x32xbf16>, vector<1x8x8xf32> -> vector<1x8x8xf32>
    %cst_24 = arith.constant -3.40282347E+38 : f32
    "tpu.trace_stop"() : () -> ()
    %57 = vector.shape_cast %10 : vector<1x1x8xi1> to vector<1x1x8xi1>
    %58 = vector.broadcast %57 : vector<1x1x8xi1> to vector<1x8x8xi1>
    %59 = vector.broadcast %cst_24 : f32 to vector<1x8x8xf32>
    %60 = arith.select %58, %56, %59 : vector<1x8x8xi1>, vector<1x8x8xf32>
    %cst_25 = arith.constant dense<0xFF800000> : vector<1x8xf32>
    %61 = vector.multi_reduction <maximumf>, %60, %cst_25 [2] : vector<1x8x8xf32> to vector<1x8xf32>
    %62 = vector.shape_cast %61 : vector<1x8xf32> to vector<1x8x1xf32>
    %63 = vector.broadcast %62 : vector<1x8x1xf32> to vector<1x8x8xf32>
    %64 = arith.subf %60, %63 : vector<1x8x8xf32>
    %65 = math.exp %64 : vector<1x8x8xf32>
    %cst_26 = arith.constant dense<0.000000e+00> : vector<1x8xf32>
    %66 = vector.multi_reduction <add>, %65, %cst_26 [2] : vector<1x8x8xf32> to vector<1x8xf32>
    %67 = vector.shape_cast %66 : vector<1x8xf32> to vector<1x8x1xf32>
    %68 = arith.truncf %65 : vector<1x8x8xf32> to vector<1x8x8xbf16>
    "tpu.trace_start"() <{level = 10 : i32, message = "bij,bjd->bid"}> : () -> ()
    %cst_27 = arith.constant dense<0.000000e+00> : vector<1x8x32xf32>
    %69 = tpu.matmul %68, %55, %cst_27 {dimension_numbers = #tpu.dot_dimension_numbers<[2], [1], [1], [2], [0, 0, 0, 1, 1, 2], [0], [0]>} : vector<1x8x8xbf16>, vector<1x8x32xbf16>, vector<1x8x32xf32> -> vector<1x8x32xf32>
    "tpu.trace_stop"() : () -> ()
    %70 = tpu.reciprocal %67 {approx = true} : vector<1x8x1xf32> -> vector<1x8x1xf32>
    %71 = vector.broadcast %70 : vector<1x8x1xf32> to vector<1x8x32xf32>
    %72 = arith.mulf %69, %71 : vector<1x8x32xf32>
    %c0_28 = arith.constant 0 : index
    %c0_29 = arith.constant 0 : index
    %c64 = arith.constant 64 : index
    %73 = vector.load %arg9[%c0_28, %c0_29, %c64] : memref<1x8x128xf32, #tpu.memory_space<vmem>>, vector<1x8x32xf32>
    tpu.vector_store %arg9[%c0_28, %c0_29, %c64], %72 {strides = array<i32>} : memref<1x8x128xf32, #tpu.memory_space<vmem>>, vector<1x8x32xf32>,
    %74 = vector.extract_strided_slice %6 {offsets = [0, 0, 96], sizes = [1, 8, 32], strides = [1, 1, 1]} : vector<1x8x384xbf16> to vector<1x8x32xbf16>
    %75 = vector.extract_strided_slice %6 {offsets = [0, 0, 224], sizes = [1, 8, 32], strides = [1, 1, 1]} : vector<1x8x384xbf16> to vector<1x8x32xbf16>
    %76 = vector.extract_strided_slice %6 {offsets = [0, 0, 352], sizes = [1, 8, 32], strides = [1, 1, 1]} : vector<1x8x384xbf16> to vector<1x8x32xbf16>
    "tpu.trace_start"() <{level = 10 : i32, message = "bid,bjd->bij"}> : () -> ()
    %cst_30 = arith.constant dense<0.000000e+00> : vector<1x8x8xf32>
    %77 = tpu.matmul %74, %75, %cst_30 {dimension_numbers = #tpu.dot_dimension_numbers<[2], [2], [1], [1], [0, 0, 0, 1, 1, 1], [0], [0]>} : vector<1x8x32xbf16>, vector<1x8x32xbf16>, vector<1x8x8xf32> -> vector<1x8x8xf32>
    %cst_31 = arith.constant -3.40282347E+38 : f32
    "tpu.trace_stop"() : () -> ()
    %78 = vector.shape_cast %10 : vector<1x1x8xi1> to vector<1x1x8xi1>
    %79 = vector.broadcast %78 : vector<1x1x8xi1> to vector<1x8x8xi1>
    %80 = vector.broadcast %cst_31 : f32 to vector<1x8x8xf32>
    %81 = arith.select %79, %77, %80 : vector<1x8x8xi1>, vector<1x8x8xf32>
    %cst_32 = arith.constant dense<0xFF800000> : vector<1x8xf32>
    %82 = vector.multi_reduction <maximumf>, %81, %cst_32 [2] : vector<1x8x8xf32> to vector<1x8xf32>
    %83 = vector.shape_cast %82 : vector<1x8xf32> to vector<1x8x1xf32>
    %84 = vector.broadcast %83 : vector<1x8x1xf32> to vector<1x8x8xf32>
    %85 = arith.subf %81, %84 : vector<1x8x8xf32>
    %86 = math.exp %85 : vector<1x8x8xf32>
    %cst_33 = arith.constant dense<0.000000e+00> : vector<1x8xf32>
    %87 = vector.multi_reduction <add>, %86, %cst_33 [2] : vector<1x8x8xf32> to vector<1x8xf32>
    %88 = vector.shape_cast %87 : vector<1x8xf32> to vector<1x8x1xf32>
    %89 = arith.truncf %86 : vector<1x8x8xf32> to vector<1x8x8xbf16>
    "tpu.trace_start"() <{level = 10 : i32, message = "bij,bjd->bid"}> : () -> ()
    %cst_34 = arith.constant dense<0.000000e+00> : vector<1x8x32xf32>
    %90 = tpu.matmul %89, %76, %cst_34 {dimension_numbers = #tpu.dot_dimension_numbers<[2], [1], [1], [2], [0, 0, 0, 1, 1, 2], [0], [0]>} : vector<1x8x8xbf16>, vector<1x8x32xbf16>, vector<1x8x32xf32> -> vector<1x8x32xf32>
    "tpu.trace_stop"() : () -> ()
    %91 = tpu.reciprocal %88 {approx = true} : vector<1x8x1xf32> -> vector<1x8x1xf32>
    %92 = vector.broadcast %91 : vector<1x8x1xf32> to vector<1x8x32xf32>
    %93 = arith.mulf %90, %92 : vector<1x8x32xf32>
    %c0_35 = arith.constant 0 : index
    %c0_36 = arith.constant 0 : index
    %c96 = arith.constant 96 : index
    %94 = vector.load %arg9[%c0_35, %c0_36, %c96] : memref<1x8x128xf32, #tpu.memory_space<vmem>>, vector<1x8x32xf32>
    tpu.vector_store %arg9[%c0_35, %c0_36, %c96], %93 {strides = array<i32>} : memref<1x8x128xf32, #tpu.memory_space<vmem>>, vector<1x8x32xf32>,
    %c0_37 = arith.constant 0 : index
    %c0_38 = arith.constant 0 : index
    %95 = vector.load %arg7[%c0_37, %c0_38] : memref<33x128xf32, #tpu.memory_space<vmem>>, vector<33x128xf32>
    %c0_39 = arith.constant 0 : index
    %c7 = arith.constant 7 : index
    %c0_40 = arith.constant 0 : index
    %96 = vector.load %arg9[%c0_39, %c7, %c0_40] : memref<1x8x128xf32, #tpu.memory_space<vmem>>, vector<1x1x128xf32>
    %97 = vector.extract_strided_slice %95 {offsets = [9, 0], sizes = [1, 128], strides = [1, 1]} : vector<33x128xf32> to vector<1x128xf32>
    %98 = vector.shape_cast %97 : vector<1x128xf32> to vector<128xf32>
    %99 = vector.extract_strided_slice %7 {offsets = [0, 0, 0], sizes = [1, 1, 128], strides = [1, 1, 1]} : vector<1x8x128xf32> to vector<1x1x128xf32>
    %100 = vector.shape_cast %98 : vector<128xf32> to vector<1x1x128xf32>
    %101 = arith.mulf %100, %99 : vector<1x1x128xf32>
    %102 = arith.addf %96, %101 : vector<1x1x128xf32>
    %c0_41 = arith.constant 0 : index
    %c7_42 = arith.constant 7 : index
    %c0_43 = arith.constant 0 : index
    %103 = vector.load %arg9[%c0_41, %c7_42, %c0_43] : memref<1x8x128xf32, #tpu.memory_space<vmem>>, vector<1x1x128xf32>
    tpu.vector_store %arg9[%c0_41, %c7_42, %c0_43], %102 {strides = array<i32>} : memref<1x8x128xf32, #tpu.memory_space<vmem>>, vector<1x1x128xf32>,
    %c0_44 = arith.constant 0 : index
    %c6 = arith.constant 6 : index
    %c0_45 = arith.constant 0 : index
    %104 = vector.load %arg9[%c0_44, %c6, %c0_45] : memref<1x8x128xf32, #tpu.memory_space<vmem>>, vector<1x2x128xf32>
    %105 = vector.extract_strided_slice %95 {offsets = [10, 0], sizes = [1, 128], strides = [1, 1]} : vector<33x128xf32> to vector<1x128xf32>
    %106 = vector.shape_cast %105 : vector<1x128xf32> to vector<128xf32>
    %107 = vector.extract_strided_slice %7 {offsets = [0, 0, 0], sizes = [1, 2, 128], strides = [1, 1, 1]} : vector<1x8x128xf32> to vector<1x2x128xf32>
    %108 = vector.shape_cast %106 : vector<128xf32> to vector<1x1x128xf32>
    %109 = vector.broadcast %108 : vector<1x1x128xf32> to vector<1x2x128xf32>
    %110 = arith.mulf %109, %107 : vector<1x2x128xf32>
    %111 = arith.addf %104, %110 : vector<1x2x128xf32>
    %c0_46 = arith.constant 0 : index
    %c6_47 = arith.constant 6 : index
    %c0_48 = arith.constant 0 : index
    %112 = vector.load %arg9[%c0_46, %c6_47, %c0_48] : memref<1x8x128xf32, #tpu.memory_space<vmem>>, vector<1x2x128xf32>
    tpu.vector_store %arg9[%c0_46, %c6_47, %c0_48], %111 {strides = array<i32>} : memref<1x8x128xf32, #tpu.memory_space<vmem>>, vector<1x2x128xf32>,
    %c0_49 = arith.constant 0 : index
    %c5 = arith.constant 5 : index
    %c0_50 = arith.constant 0 : index
    %113 = vector.load %arg9[%c0_49, %c5, %c0_50] : memref<1x8x128xf32, #tpu.memory_space<vmem>>, vector<1x3x128xf32>
    %114 = vector.extract_strided_slice %95 {offsets = [11, 0], sizes = [1, 128], strides = [1, 1]} : vector<33x128xf32> to vector<1x128xf32>
    %115 = vector.shape_cast %114 : vector<1x128xf32> to vector<128xf32>
    %116 = vector.extract_strided_slice %7 {offsets = [0, 0, 0], sizes = [1, 3, 128], strides = [1, 1, 1]} : vector<1x8x128xf32> to vector<1x3x128xf32>
    %117 = vector.shape_cast %115 : vector<128xf32> to vector<1x1x128xf32>
    %118 = vector.broadcast %117 : vector<1x1x128xf32> to vector<1x3x128xf32>
    %119 = arith.mulf %118, %116 : vector<1x3x128xf32>
    %120 = arith.addf %113, %119 : vector<1x3x128xf32>
    %c0_51 = arith.constant 0 : index
    %c5_52 = arith.constant 5 : index
    %c0_53 = arith.constant 0 : index
    %121 = vector.load %arg9[%c0_51, %c5_52, %c0_53] : memref<1x8x128xf32, #tpu.memory_space<vmem>>, vector<1x3x128xf32>
    tpu.vector_store %arg9[%c0_51, %c5_52, %c0_53], %120 {strides = array<i32>} : memref<1x8x128xf32, #tpu.memory_space<vmem>>, vector<1x3x128xf32>,
    %c0_54 = arith.constant 0 : index
    %c4 = arith.constant 4 : index
    %c0_55 = arith.constant 0 : index
    %122 = vector.load %arg9[%c0_54, %c4, %c0_55] : memref<1x8x128xf32, #tpu.memory_space<vmem>>, vector<1x4x128xf32>
    %123 = vector.extract_strided_slice %95 {offsets = [12, 0], sizes = [1, 128], strides = [1, 1]} : vector<33x128xf32> to vector<1x128xf32>
    %124 = vector.shape_cast %123 : vector<1x128xf32> to vector<128xf32>
    %125 = vector.extract_strided_slice %7 {offsets = [0, 0, 0], sizes = [1, 4, 128], strides = [1, 1, 1]} : vector<1x8x128xf32> to vector<1x4x128xf32>
    %126 = vector.shape_cast %124 : vector<128xf32> to vector<1x1x128xf32>
    %127 = vector.broadcast %126 : vector<1x1x128xf32> to vector<1x4x128xf32>
    %128 = arith.mulf %127, %125 : vector<1x4x128xf32>
    %129 = arith.addf %122, %128 : vector<1x4x128xf32>
    %c0_56 = arith.constant 0 : index
    %c4_57 = arith.constant 4 : index
    %c0_58 = arith.constant 0 : index
    %130 = vector.load %arg9[%c0_56, %c4_57, %c0_58] : memref<1x8x128xf32, #tpu.memory_space<vmem>>, vector<1x4x128xf32>
    tpu.vector_store %arg9[%c0_56, %c4_57, %c0_58], %129 {strides = array<i32>} : memref<1x8x128xf32, #tpu.memory_space<vmem>>, vector<1x4x128xf32>,
    %c0_59 = arith.constant 0 : index
    %c3 = arith.constant 3 : index
    %c0_60 = arith.constant 0 : index
    %131 = vector.load %arg9[%c0_59, %c3, %c0_60] : memref<1x8x128xf32, #tpu.memory_space<vmem>>, vector<1x5x128xf32>
    %132 = vector.extract_strided_slice %95 {offsets = [13, 0], sizes = [1, 128], strides = [1, 1]} : vector<33x128xf32> to vector<1x128xf32>
    %133 = vector.shape_cast %132 : vector<1x128xf32> to vector<128xf32>
    %134 = vector.extract_strided_slice %7 {offsets = [0, 0, 0], sizes = [1, 5, 128], strides = [1, 1, 1]} : vector<1x8x128xf32> to vector<1x5x128xf32>
    %135 = vector.shape_cast %133 : vector<128xf32> to vector<1x1x128xf32>
    %136 = vector.broadcast %135 : vector<1x1x128xf32> to vector<1x5x128xf32>
    %137 = arith.mulf %136, %134 : vector<1x5x128xf32>
    %138 = arith.addf %131, %137 : vector<1x5x128xf32>
    %c0_61 = arith.constant 0 : index
    %c3_62 = arith.constant 3 : index
    %c0_63 = arith.constant 0 : index
    %139 = vector.load %arg9[%c0_61, %c3_62, %c0_63] : memref<1x8x128xf32, #tpu.memory_space<vmem>>, vector<1x5x128xf32>
    tpu.vector_store %arg9[%c0_61, %c3_62, %c0_63], %138 {strides = array<i32>} : memref<1x8x128xf32, #tpu.memory_space<vmem>>, vector<1x5x128xf32>,
    %c0_64 = arith.constant 0 : index
    %c2 = arith.constant 2 : index
    %c0_65 = arith.constant 0 : index
    %140 = vector.load %arg9[%c0_64, %c2, %c0_65] : memref<1x8x128xf32, #tpu.memory_space<vmem>>, vector<1x6x128xf32>
    %141 = vector.extract_strided_slice %95 {offsets = [14, 0], sizes = [1, 128], strides = [1, 1]} : vector<33x128xf32> to vector<1x128xf32>
    %142 = vector.shape_cast %141 : vector<1x128xf32> to vector<128xf32>
    %143 = vector.extract_strided_slice %7 {offsets = [0, 0, 0], sizes = [1, 6, 128], strides = [1, 1, 1]} : vector<1x8x128xf32> to vector<1x6x128xf32>
    %144 = vector.shape_cast %142 : vector<128xf32> to vector<1x1x128xf32>
    %145 = vector.broadcast %144 : vector<1x1x128xf32> to vector<1x6x128xf32>
    %146 = arith.mulf %145, %143 : vector<1x6x128xf32>
    %147 = arith.addf %140, %146 : vector<1x6x128xf32>
    %c0_66 = arith.constant 0 : index
    %c2_67 = arith.constant 2 : index
    %c0_68 = arith.constant 0 : index
    %148 = vector.load %arg9[%c0_66, %c2_67, %c0_68] : memref<1x8x128xf32, #tpu.memory_space<vmem>>, vector<1x6x128xf32>
    tpu.vector_store %arg9[%c0_66, %c2_67, %c0_68], %147 {strides = array<i32>} : memref<1x8x128xf32, #tpu.memory_space<vmem>>, vector<1x6x128xf32>,
    %c0_69 = arith.constant 0 : index
    %c1 = arith.constant 1 : index
    %c0_70 = arith.constant 0 : index
    %149 = vector.load %arg9[%c0_69, %c1, %c0_70] : memref<1x8x128xf32, #tpu.memory_space<vmem>>, vector<1x7x128xf32>
    %150 = vector.extract_strided_slice %95 {offsets = [15, 0], sizes = [1, 128], strides = [1, 1]} : vector<33x128xf32> to vector<1x128xf32>
    %151 = vector.shape_cast %150 : vector<1x128xf32> to vector<128xf32>
    %152 = vector.extract_strided_slice %7 {offsets = [0, 0, 0], sizes = [1, 7, 128], strides = [1, 1, 1]} : vector<1x8x128xf32> to vector<1x7x128xf32>
    %153 = vector.shape_cast %151 : vector<128xf32> to vector<1x1x128xf32>
    %154 = vector.broadcast %153 : vector<1x1x128xf32> to vector<1x7x128xf32>
    %155 = arith.mulf %154, %152 : vector<1x7x128xf32>
    %156 = arith.addf %149, %155 : vector<1x7x128xf32>
    %c0_71 = arith.constant 0 : index
    %c1_72 = arith.constant 1 : index
    %c0_73 = arith.constant 0 : index
    %157 = vector.load %arg9[%c0_71, %c1_72, %c0_73] : memref<1x8x128xf32, #tpu.memory_space<vmem>>, vector<1x7x128xf32>
    tpu.vector_store %arg9[%c0_71, %c1_72, %c0_73], %156 {strides = array<i32>} : memref<1x8x128xf32, #tpu.memory_space<vmem>>, vector<1x7x128xf32>,
    %c0_74 = arith.constant 0 : index
    %c0_75 = arith.constant 0 : index
    %c0_76 = arith.constant 0 : index
    %158 = vector.load %arg9[%c0_74, %c0_75, %c0_76] : memref<1x8x128xf32, #tpu.memory_space<vmem>>, vector<1x8x128xf32>
    %159 = vector.extract_strided_slice %95 {offsets = [16, 0], sizes = [1, 128], strides = [1, 1]} : vector<33x128xf32> to vector<1x128xf32>
    %160 = vector.shape_cast %159 : vector<1x128xf32> to vector<128xf32>
    %161 = vector.shape_cast %160 : vector<128xf32> to vector<1x1x128xf32>
    %162 = vector.broadcast %161 : vector<1x1x128xf32> to vector<1x8x128xf32>
    %163 = arith.mulf %162, %7 : vector<1x8x128xf32>
    %164 = arith.addf %158, %163 : vector<1x8x128xf32>
    %c0_77 = arith.constant 0 : index
    %c0_78 = arith.constant 0 : index
    %c0_79 = arith.constant 0 : index
    %165 = vector.load %arg9[%c0_77, %c0_78, %c0_79] : memref<1x8x128xf32, #tpu.memory_space<vmem>>, vector<1x8x128xf32>
    tpu.vector_store %arg9[%c0_77, %c0_78, %c0_79], %164 {strides = array<i32>} : memref<1x8x128xf32, #tpu.memory_space<vmem>>, vector<1x8x128xf32>,
    %c0_80 = arith.constant 0 : index
    %c0_81 = arith.constant 0 : index
    %c0_82 = arith.constant 0 : index
    %166 = vector.load %arg9[%c0_80, %c0_81, %c0_82] : memref<1x8x128xf32, #tpu.memory_space<vmem>>, vector<1x7x128xf32>
    %167 = vector.extract_strided_slice %95 {offsets = [17, 0], sizes = [1, 128], strides = [1, 1]} : vector<33x128xf32> to vector<1x128xf32>
    %168 = vector.shape_cast %167 : vector<1x128xf32> to vector<128xf32>
    %169 = vector.extract_strided_slice %7 {offsets = [0, 1, 0], sizes = [1, 7, 128], strides = [1, 1, 1]} : vector<1x8x128xf32> to vector<1x7x128xf32>
    %170 = vector.shape_cast %168 : vector<128xf32> to vector<1x1x128xf32>
    %171 = vector.broadcast %170 : vector<1x1x128xf32> to vector<1x7x128xf32>
    %172 = arith.mulf %171, %169 : vector<1x7x128xf32>
    %173 = arith.addf %166, %172 : vector<1x7x128xf32>
    %c0_83 = arith.constant 0 : index
    %c0_84 = arith.constant 0 : index
    %c0_85 = arith.constant 0 : index
    %174 = vector.load %arg9[%c0_83, %c0_84, %c0_85] : memref<1x8x128xf32, #tpu.memory_space<vmem>>, vector<1x7x128xf32>
    tpu.vector_store %arg9[%c0_83, %c0_84, %c0_85], %173 {strides = array<i32>} : memref<1x8x128xf32, #tpu.memory_space<vmem>>, vector<1x7x128xf32>,
    %c0_86 = arith.constant 0 : index
    %c0_87 = arith.constant 0 : index
    %c0_88 = arith.constant 0 : index
    %175 = vector.load %arg9[%c0_86, %c0_87, %c0_88] : memref<1x8x128xf32, #tpu.memory_space<vmem>>, vector<1x6x128xf32>
    %176 = vector.extract_strided_slice %95 {offsets = [18, 0], sizes = [1, 128], strides = [1, 1]} : vector<33x128xf32> to vector<1x128xf32>
    %177 = vector.shape_cast %176 : vector<1x128xf32> to vector<128xf32>
    %178 = vector.extract_strided_slice %7 {offsets = [0, 2, 0], sizes = [1, 6, 128], strides = [1, 1, 1]} : vector<1x8x128xf32> to vector<1x6x128xf32>
    %179 = vector.shape_cast %177 : vector<128xf32> to vector<1x1x128xf32>
    %180 = vector.broadcast %179 : vector<1x1x128xf32> to vector<1x6x128xf32>
    %181 = arith.mulf %180, %178 : vector<1x6x128xf32>
    %182 = arith.addf %175, %181 : vector<1x6x128xf32>
    %c0_89 = arith.constant 0 : index
    %c0_90 = arith.constant 0 : index
    %c0_91 = arith.constant 0 : index
    %183 = vector.load %arg9[%c0_89, %c0_90, %c0_91] : memref<1x8x128xf32, #tpu.memory_space<vmem>>, vector<1x6x128xf32>
    tpu.vector_store %arg9[%c0_89, %c0_90, %c0_91], %182 {strides = array<i32>} : memref<1x8x128xf32, #tpu.memory_space<vmem>>, vector<1x6x128xf32>,
    %c0_92 = arith.constant 0 : index
    %c0_93 = arith.constant 0 : index
    %c0_94 = arith.constant 0 : index
    %184 = vector.load %arg9[%c0_92, %c0_93, %c0_94] : memref<1x8x128xf32, #tpu.memory_space<vmem>>, vector<1x5x128xf32>
    %185 = vector.extract_strided_slice %95 {offsets = [19, 0], sizes = [1, 128], strides = [1, 1]} : vector<33x128xf32> to vector<1x128xf32>
    %186 = vector.shape_cast %185 : vector<1x128xf32> to vector<128xf32>
    %187 = vector.extract_strided_slice %7 {offsets = [0, 3, 0], sizes = [1, 5, 128], strides = [1, 1, 1]} : vector<1x8x128xf32> to vector<1x5x128xf32>
    %188 = vector.shape_cast %186 : vector<128xf32> to vector<1x1x128xf32>
    %189 = vector.broadcast %188 : vector<1x1x128xf32> to vector<1x5x128xf32>
    %190 = arith.mulf %189, %187 : vector<1x5x128xf32>
    %191 = arith.addf %184, %190 : vector<1x5x128xf32>
    %c0_95 = arith.constant 0 : index
    %c0_96 = arith.constant 0 : index
    %c0_97 = arith.constant 0 : index
    %192 = vector.load %arg9[%c0_95, %c0_96, %c0_97] : memref<1x8x128xf32, #tpu.memory_space<vmem>>, vector<1x5x128xf32>
    tpu.vector_store %arg9[%c0_95, %c0_96, %c0_97], %191 {strides = array<i32>} : memref<1x8x128xf32, #tpu.memory_space<vmem>>, vector<1x5x128xf32>,
    %c0_98 = arith.constant 0 : index
    %c0_99 = arith.constant 0 : index
    %c0_100 = arith.constant 0 : index
    %193 = vector.load %arg9[%c0_98, %c0_99, %c0_100] : memref<1x8x128xf32, #tpu.memory_space<vmem>>, vector<1x4x128xf32>
    %194 = vector.extract_strided_slice %95 {offsets = [20, 0], sizes = [1, 128], strides = [1, 1]} : vector<33x128xf32> to vector<1x128xf32>
    %195 = vector.shape_cast %194 : vector<1x128xf32> to vector<128xf32>
    %196 = vector.extract_strided_slice %7 {offsets = [0, 4, 0], sizes = [1, 4, 128], strides = [1, 1, 1]} : vector<1x8x128xf32> to vector<1x4x128xf32>
    %197 = vector.shape_cast %195 : vector<128xf32> to vector<1x1x128xf32>
    %198 = vector.broadcast %197 : vector<1x1x128xf32> to vector<1x4x128xf32>
    %199 = arith.mulf %198, %196 : vector<1x4x128xf32>
    %200 = arith.addf %193, %199 : vector<1x4x128xf32>
    %c0_101 = arith.constant 0 : index
    %c0_102 = arith.constant 0 : index
    %c0_103 = arith.constant 0 : index
    %201 = vector.load %arg9[%c0_101, %c0_102, %c0_103] : memref<1x8x128xf32, #tpu.memory_space<vmem>>, vector<1x4x128xf32>
    tpu.vector_store %arg9[%c0_101, %c0_102, %c0_103], %200 {strides = array<i32>} : memref<1x8x128xf32, #tpu.memory_space<vmem>>, vector<1x4x128xf32>,
    %c0_104 = arith.constant 0 : index
    %c0_105 = arith.constant 0 : index
    %c0_106 = arith.constant 0 : index
    %202 = vector.load %arg9[%c0_104, %c0_105, %c0_106] : memref<1x8x128xf32, #tpu.memory_space<vmem>>, vector<1x3x128xf32>
    %203 = vector.extract_strided_slice %95 {offsets = [21, 0], sizes = [1, 128], strides = [1, 1]} : vector<33x128xf32> to vector<1x128xf32>
    %204 = vector.shape_cast %203 : vector<1x128xf32> to vector<128xf32>
    %205 = vector.extract_strided_slice %7 {offsets = [0, 5, 0], sizes = [1, 3, 128], strides = [1, 1, 1]} : vector<1x8x128xf32> to vector<1x3x128xf32>
    %206 = vector.shape_cast %204 : vector<128xf32> to vector<1x1x128xf32>
    %207 = vector.broadcast %206 : vector<1x1x128xf32> to vector<1x3x128xf32>
    %208 = arith.mulf %207, %205 : vector<1x3x128xf32>
    %209 = arith.addf %202, %208 : vector<1x3x128xf32>
    %c0_107 = arith.constant 0 : index
    %c0_108 = arith.constant 0 : index
    %c0_109 = arith.constant 0 : index
    %210 = vector.load %arg9[%c0_107, %c0_108, %c0_109] : memref<1x8x128xf32, #tpu.memory_space<vmem>>, vector<1x3x128xf32>
    tpu.vector_store %arg9[%c0_107, %c0_108, %c0_109], %209 {strides = array<i32>} : memref<1x8x128xf32, #tpu.memory_space<vmem>>, vector<1x3x128xf32>,
    %c0_110 = arith.constant 0 : index
    %c0_111 = arith.constant 0 : index
    %c0_112 = arith.constant 0 : index
    %211 = vector.load %arg9[%c0_110, %c0_111, %c0_112] : memref<1x8x128xf32, #tpu.memory_space<vmem>>, vector<1x2x128xf32>
    %212 = vector.extract_strided_slice %95 {offsets = [22, 0], sizes = [1, 128], strides = [1, 1]} : vector<33x128xf32> to vector<1x128xf32>
    %213 = vector.shape_cast %212 : vector<1x128xf32> to vector<128xf32>
    %214 = vector.extract_strided_slice %7 {offsets = [0, 6, 0], sizes = [1, 2, 128], strides = [1, 1, 1]} : vector<1x8x128xf32> to vector<1x2x128xf32>
    %215 = vector.shape_cast %213 : vector<128xf32> to vector<1x1x128xf32>
    %216 = vector.broadcast %215 : vector<1x1x128xf32> to vector<1x2x128xf32>
    %217 = arith.mulf %216, %214 : vector<1x2x128xf32>
    %218 = arith.addf %211, %217 : vector<1x2x128xf32>
    %c0_113 = arith.constant 0 : index
    %c0_114 = arith.constant 0 : index
    %c0_115 = arith.constant 0 : index
    %219 = vector.load %arg9[%c0_113, %c0_114, %c0_115] : memref<1x8x128xf32, #tpu.memory_space<vmem>>, vector<1x2x128xf32>
    tpu.vector_store %arg9[%c0_113, %c0_114, %c0_115], %218 {strides = array<i32>} : memref<1x8x128xf32, #tpu.memory_space<vmem>>, vector<1x2x128xf32>,
    %c0_116 = arith.constant 0 : index
    %c0_117 = arith.constant 0 : index
    %c0_118 = arith.constant 0 : index
    %220 = vector.load %arg9[%c0_116, %c0_117, %c0_118] : memref<1x8x128xf32, #tpu.memory_space<vmem>>, vector<1x1x128xf32>
    %221 = vector.extract_strided_slice %95 {offsets = [23, 0], sizes = [1, 128], strides = [1, 1]} : vector<33x128xf32> to vector<1x128xf32>
    %222 = vector.shape_cast %221 : vector<1x128xf32> to vector<128xf32>
    %223 = vector.extract_strided_slice %7 {offsets = [0, 7, 0], sizes = [1, 1, 128], strides = [1, 1, 1]} : vector<1x8x128xf32> to vector<1x1x128xf32>
    %224 = vector.shape_cast %222 : vector<128xf32> to vector<1x1x128xf32>
    %225 = arith.mulf %224, %223 : vector<1x1x128xf32>
    %226 = arith.addf %220, %225 : vector<1x1x128xf32>
    %c0_119 = arith.constant 0 : index
    %c0_120 = arith.constant 0 : index
    %c0_121 = arith.constant 0 : index
    %227 = vector.load %arg9[%c0_119, %c0_120, %c0_121] : memref<1x8x128xf32, #tpu.memory_space<vmem>>, vector<1x1x128xf32>
    tpu.vector_store %arg9[%c0_119, %c0_120, %c0_121], %226 {strides = array<i32>} : memref<1x8x128xf32, #tpu.memory_space<vmem>>, vector<1x1x128xf32>,
    %c0_122 = arith.constant 0 : index
    %c0_123 = arith.constant 0 : index
    %c0_124 = arith.constant 0 : index
    %228 = vector.load %arg9[%c0_122, %c0_123, %c0_124] : memref<1x8x128xf32, #tpu.memory_space<vmem>>, vector<1x8x128xf32>
    %229 = vector.shape_cast %228 : vector<1x8x128xf32> to vector<8x128xf32>
    %230 = arith.truncf %229 : vector<8x128xf32> to vector<8x128xbf16>
    %c0_125 = arith.constant 0 : index
    %c0_126 = arith.constant 0 : index
    %231 = vector.load %arg5[%c0_125, %c0_126] : memref<128x128xbf16, #tpu.memory_space<vmem>>, vector<128x128xbf16>
    %cst_127 = arith.constant dense<0.000000e+00> : vector<8x128xf32>
    %232 = tpu.matmul %230, %231, %cst_127 {dimension_numbers = #tpu.dot_dimension_numbers<[1], [0], [0], [1], [0, 0, 1, 1], [], []>} : vector<8x128xbf16>, vector<128x128xbf16>, vector<8x128xf32> -> vector<8x128xf32>
    %233 = vector.shape_cast %232 : vector<8x128xf32> to vector<1x8x128xf32>
    %c0_128 = arith.constant 0 : index
    %c0_129 = arith.constant 0 : index
    %234 = vector.load %arg6[%c0_128, %c0_129] : memref<1x128xf32, #tpu.memory_space<vmem>>, vector<1x128xf32>
    %235 = vector.shape_cast %234 : vector<1x128xf32> to vector<1x1x128xf32>
    %236 = vector.broadcast %235 : vector<1x1x128xf32> to vector<1x8x128xf32>
    %237 = arith.addf %233, %236 : vector<1x8x128xf32>
    %c0_130 = arith.constant 0 : index
    %c0_131 = arith.constant 0 : index
    %c0_132 = arith.constant 0 : index
    %238 = vector.load %arg3[%c0_130, %c0_131, %c0_132] : memref<1x8x1xf32, #tpu.memory_space<vmem>>, vector<1x8x1xf32>
    %cst_133 = arith.constant 0.000000e+00 : f32
    %239 = vector.broadcast %cst_133 : f32 to vector<1x8x1xf32>
    %240 = arith.cmpf ogt, %238, %239 : vector<1x8x1xf32>
    %cst_134 = arith.constant 0.000000e+00 : f32
    %241 = vector.shape_cast %240 : vector<1x8x1xi1> to vector<1x8x1xi1>
    %242 = vector.broadcast %241 : vector<1x8x1xi1> to vector<1x8x128xi1>
    %243 = vector.broadcast %cst_134 : f32 to vector<1x8x128xf32>
    %244 = arith.select %242, %237, %243 : vector<1x8x128xi1>, vector<1x8x128xf32>
    %c0_135 = arith.constant 0 : index
    %c0_136 = arith.constant 0 : index
    %c0_137 = arith.constant 0 : index
    %245 = vector.load %arg8[%c0_135, %c0_136, %c0_137] : memref<1x8x128xf32, #tpu.memory_space<vmem>>, vector<1x8x128xf32>
    tpu.vector_store %arg8[%c0_135, %c0_136, %c0_137], %244 {strides = array<i32>} : memref<1x8x128xf32, #tpu.memory_space<vmem>>, vector<1x8x128xf32>,
    return
  }
  func.func @transform_0(%arg0: i32) -> (i32, i32, i32) {
    %c0_i32 = arith.constant 0 : i32
    %c0_i32_0 = arith.constant 0 : i32
    %c0_i32_1 = arith.constant 0 : i32
    return %arg0, %c0_i32, %c0_i32_0 : i32, i32, i32
  }
  func.func @transform_1(%arg0: i32) -> (i32, i32, i32) {
    %c0_i32 = arith.constant 0 : i32
    %c0_i32_0 = arith.constant 0 : i32
    %c0_i32_1 = arith.constant 0 : i32
    return %arg0, %c0_i32, %c0_i32_0 : i32, i32, i32
  }
  func.func @transform_2(%arg0: i32) -> (i32, i32, i32) {
    %c0_i32 = arith.constant 0 : i32
    %c0_i32_0 = arith.constant 0 : i32
    %c0_i32_1 = arith.constant 0 : i32
    return %arg0, %c0_i32, %c0_i32_0 : i32, i32, i32
  }
  func.func @transform_3(%arg0: i32) -> (i32, i32) {
    %c0_i32 = arith.constant 0 : i32
    %c0_i32_0 = arith.constant 0 : i32
    %c0_i32_1 = arith.constant 0 : i32
    return %c0_i32, %c0_i32_0 : i32, i32
  }
  func.func @transform_4(%arg0: i32) -> (i32, i32) {
    %c0_i32 = arith.constant 0 : i32
    %c0_i32_0 = arith.constant 0 : i32
    %c0_i32_1 = arith.constant 0 : i32
    return %c0_i32, %c0_i32_0 : i32, i32
  }
  func.func @transform_5(%arg0: i32) -> (i32, i32) {
    %c0_i32 = arith.constant 0 : i32
    %c0_i32_0 = arith.constant 0 : i32
    %c0_i32_1 = arith.constant 0 : i32
    return %c0_i32, %c0_i32_0 : i32, i32
  }
  func.func @transform_6(%arg0: i32) -> (i32, i32) {
    %c0_i32 = arith.constant 0 : i32
    %c0_i32_0 = arith.constant 0 : i32
    %c0_i32_1 = arith.constant 0 : i32
    return %c0_i32, %c0_i32_0 : i32, i32
  }
  func.func @transform_7(%arg0: i32) -> (i32, i32, i32) {
    %c0_i32 = arith.constant 0 : i32
    %c0_i32_0 = arith.constant 0 : i32
    %c0_i32_1 = arith.constant 0 : i32
    return %arg0, %c0_i32, %c0_i32_0 : i32, i32, i32
  }
}

</mosaic_0001>

<bundles_post_ra>
// kernel: tpu_custom_call.1
= control target key start
LH: loop header
LB: loop body
LE: loop exit
PB: predicated region body
PF: predicated region fallthrough
CT: control target
= control target key end

     0   :  { %s2617_s0 = inlined_call_operand.hbm [shape: f32[2,8,128], index: 0, kind: input, shape index: {}]   ;;  %s2618_s1 = inlined_call_operand.hbm [shape: f32[2,1,8], index: 1, kind: input, shape index: {}]   ;;  %s2619_s2 = inlined_call_operand.vmem [shape: f32[2,8,1], index: 2, kind: input, shape index: {}]   ;;  %s2620_s3 = inlined_call_operand.hbm [shape: bf16[128,384], index: 3, kind: input, shape index: {}]   ;;  %s2621_s4 = inlined_call_operand.hbm [shape: bf16[128,128], index: 4, kind: input, shape index: {}]   ;;  %s2622_s5 = inlined_call_operand.hbm [shape: f32[1,128], index: 5, kind: input, shape index: {}]   ;;  %s2623_s6 = inlined_call_operand.vmem [shape: f32[33,128], index: 6, kind: input, shape index: {}]   ;;  %s2624_s7 = inlined_call_operand.hbm [shape: f32[2,8,128], index: 7, kind: output, shape index: {}]  }
   0x1   :  { %2630 = sst [smem:[#allocation19_spill]] %s2620_s3 }
   0x2   :  { %12 = vsyncpa [#allocation4], 0 }
   0x3   :  { %14 = vsyncpa [#allocation4 + $0x1], 0 }
   0x4   :  { %15 = vsyncpa [#allocation7], 0 }
   0x5   :  { %17 = vsyncpa [#allocation7 + $0x1], 0 }
   0x6   :  { %18 = vsyncpa [#allocation10], 0 }
   0x7   :  { %19 = vsyncpa [#allocation5], 0 }
   0x8   :  { %21 = vsyncpa [#allocation5 + $0x1], 0  ;;  %s2125_s24 = smov 0   ;;  %s2127_s25 = smov 0  }
   0x9   :  { %s2129_s26 = smov 0   ;;  %s2131_s27 = smov 0  }
   0xa LB: > { %s2146_s28 = sadd.s32 4294967295, %s2067_s27   ;;  %s1512_s29 = sadd.s32 4294967294, %s2067_s27   ;;  %s2067_s27 = sphi %s2131_s27, %s2654_s27   ;;  %s2063_s26 = sphi %s2129_s26, %s2653_s26   ;;  %s2059_s25 = sphi %s2127_s25, %s2652_s25   ;;  %s2055_s24 = sphi %s2125_s24, %s2651_s24  }
   0xb   : > { %p47_p0 = scmp.ne.s32.totalorder %s2059_s25, %s2055_s24  ;;  %p2625_p1 = scmp.eq.s32.totalorder %s2146_s28, 0 }
   0xc   : > { %p213_p3 = scmp.eq.s32.totalorder %s1512_s29, 1  ;;  %p1513_p5 = scmp.ge.s32.totalorder %s2067_s27, 1 }
   0xd   : > { %p2155_p4 = por %p2625_p1, %p47_p0  ;;  %p220_p7 = scmp.lt.s32.totalorder %s2067_s27, 3 }
   0xe   : > { %p2160_p6 = por %p213_p3, %p47_p0  ;;  %s2069_s10 = smov [#allocation8]  }
   0xf   : > { %s2631_s30 = scalar_select %p2155_p4, 1, 0 }
  0x10   : > { %s2632_s8 = scalar_select %p2160_p6, 1, 0 }
  0x11   : > { %p2165_p8 = pnand %p1513_p5, %p220_p7  ;;  %s232_s11 = sshll.u32 %s2069_s10, 4  ;;  %s2169_s11 = int_to_ptr.vmem [resolvable:$true] %s232_s11 }
  0x12   : > { %2633 = sst [smem:[#allocation18_spill]] %s2632_s8  ;;  %s2070_s13 = smov [#allocation9]  }
  0x13   : > { %s2634_s9 = scalar_select %p2165_p8, 1, 0 }
  0x14   : > { %p1713_p9 = pneg %p2165_p8  ;;  %s245_s14 = sshll.u32 %s2070_s13, 4  ;;  %s2180_s14 = int_to_ptr.vmem [resolvable:$true] %s245_s14 }
  0x15   : > { %s2636_s3 = sld [smem:[#allocation19_spill]] }
  0x16   : > { %p2176_p11 = pnand %p1713_p9, %p2625_p1 }
  0x18   : > { %p2190_p13 = pneg %p2176_p11 }
  0x1b   : > { %s1845_s17 = scalar_lea.hbm %s2636_s3, 3072 }
  0x1c   : > { %p1846_p12 = scmp.ne.s32.totalorder %s2636_s3, %s1845_s17  ;;  %p1852_p5 = scmp.lt.u32.totalorder %s1845_s17, %s2636_s3 }
  0x1e   : > { %p1848_p0 = pnand %p2190_p13, %p1846_p12 }
  0x20   : > { %p1849_p3 = pneg %p1848_p0 }
  0x22   : > { %p1854_p7 = pnand %p1852_p5, %p1849_p3 }
  0x24   : > { %1857 = shalt.err (!%p1854_p7)
}
  0x25   : > { %s1858_s23 = scalar_lea.vmem %s2169_s11, 3072  ;;  %p1866_p2 = scmp.lt.s32.totalorder %s2169_s11, %s2169_s11 }
  0x26   : > { %p1859_p9 = scmp.ne.s32.totalorder %s2169_s11, %s1858_s23  ;;  %p1867_p6 = scmp.lt.s32.totalorder %s1858_s23, %s1858_s23 }
  0x28   : > { %p1861_p10 = pnand %p1859_p9, %p2190_p13  ;;  %p1868_p12 = por %p1867_p6, %p1866_p2 }
  0x2a   : > { %p1862_p1 = pneg %p1861_p10 }
  0x2c   : > { %p1869_p0 = pnand %p1868_p12, %p1862_p1 }
  0x2e   : > { %1872 = shalt.err (!%p1869_p0)
}
  0x2f   : > { %s2071_s29 = smov 192   ;;  %s2072_s10 = smov 12  }
  0x30   : > { %1716 = dma.hbm_to_vmem [thread:$0]  (!%p2176_p11), %s2636_s3, 3072, %s2169_s11, [#allocation7], %s2071_s29, %s2071_s29, %s2072_s10  }
  0x31   : > { %s1873_s18 = scalar_lea.hbm %s2621_s4, 1024 }
  0x32   : > { %p1874_p2 = scmp.ne.s32.totalorder %s2621_s4, %s1873_s18  ;;  %p1880_p10 = scmp.lt.u32.totalorder %s1873_s18, %s2621_s4 }
  0x34   : > { %p1876_p1 = pnand %p1874_p2, %p2190_p13 }
  0x36   : > { %p1877_p6 = pneg %p1876_p1 }
  0x38   : > { %p1882_p3 = pnand %p1880_p10, %p1877_p6 }
  0x3a   : > { %1885 = shalt.err (!%p1882_p3)
}
  0x3b   : > { %s1886_s11 = scalar_lea.vmem %s2180_s14, 1024  ;;  %p1894_p12 = scmp.lt.s32.totalorder %s2180_s14, %s2180_s14 }
  0x3c   : > { %p1887_p5 = scmp.ne.s32.totalorder %s2180_s14, %s1886_s11  ;;  %p1895_p0 = scmp.lt.s32.totalorder %s1886_s11, %s1886_s11 }
  0x3e   : > { %p1889_p7 = pnand %p1887_p5, %p2190_p13  ;;  %p1896_p2 = por %p1895_p0, %p1894_p12 }
  0x40   : > { %p1890_p9 = pneg %p1889_p7 }
  0x42   : > { %p1897_p1 = pnand %p1896_p2, %p1890_p9 }
  0x44   : > { %1900 = shalt.err (!%p1897_p1)
}
  0x45   : > { %s2073_s29 = smov 64   ;;  %s2074_s10 = smov 4  }
  0x46   : > { %1719 = dma.hbm_to_vmem [thread:$0]  (!%p2176_p11), %s2621_s4, 1024, %s2180_s14, [#allocation10], %s2073_s29, %s2073_s29, %s2074_s10  }
  0x47   : > { %s2075_s16 = smov [#allocation11]   ;;  %s2235_s18 = sadd.s32 1, %s2067_s27  }
  0x48   : > { %s259_s17 = sshll.u32 %s2075_s16, 4  ;;  %s1901_s22 = scalar_lea.hbm %s2622_s5, 16  ;;  %s260_s17 = int_to_ptr.vmem [resolvable:$true] %s259_s17 }
  0x49   : > { %p1902_p6 = scmp.ne.s32.totalorder %s2622_s5, %s1901_s22  ;;  %p1908_p5 = scmp.lt.u32.totalorder %s1901_s22, %s2622_s5 }
  0x4b   : > { %p1904_p10 = pnand %p1902_p6, %p2190_p13 }
  0x4d   : > { %p1905_p3 = pneg %p1904_p10 }
  0x4f   : > { %p1910_p7 = pnand %p1908_p5, %p1905_p3 }
  0x51   : > { %1913 = shalt.err (!%p1910_p7)
}
  0x52   : > { %s1914_s14 = scalar_lea.vmem %s260_s17, 16  ;;  %s1921_s29 = scalar_lea.vmem %s260_s17, 32 }
  0x53   : > { %p1915_p9 = scmp.ne.s32.totalorder %s260_s17, %s1914_s14  ;;  %p1922_p2 = scmp.lt.s32.totalorder %s260_s17, %s260_s17 }
  0x54   : > { %p1923_p1 = scmp.lt.s32.totalorder %s1921_s29, %s1914_s14 }
  0x55   : > { %p1917_p12 = pnand %p1915_p9, %p2190_p13 }
  0x56   : > { %p1924_p4 = por %p1923_p1, %p1922_p2 }
  0x57   : > { %p1918_p0 = pneg %p1917_p12 }
  0x59   : > { %p1925_p8 = pnand %p1924_p4, %p1918_p0 }
  0x5b   : > { %1928 = shalt.err (!%p1925_p8)
}
  0x5c   : > { %1722 = dma.hbm_to_vmem [thread:$0]  (!%p2176_p11), %s2622_s5, 16, %s260_s17, [#allocation10]  }
  0x5d   : > { %s31_s3 = ssub.s32 %s2067_s27, %s2235_s18  ;;  %s34_s8 = sadd.s32 1, %s2063_s26 }
  0x5e   : > { %p32_p4 = scmp.eq.s32.totalorder %s31_s3, 0  ;;  %p41_p8 = scmp.ne.s32.totalorder %s2063_s26, %s2059_s25 }
  0x5f   : > { %p42_p13 = scmp.eq.s32.totalorder %s2067_s27, 0  ;;  %p1737_p6 = scmp.lt.s32.totalorder %s2067_s27, 2 }
  0x60   : > { %s2263_s12 = scalar_select %p32_p4, %s2063_s26, %s34_s8  }
  0x61   : > { %p43_p10 = por %p42_p13, %p41_p8  ;;  %p2638_p3 = scmp.eq.s32.totalorder %s2146_s28, 1 }
  0x62   : > { %s2272_s15 = sand.u32 1, %s2063_s26   ;;  %s1519_s16 = sshll.u32 %s2067_s27, 7 }
  0x63   : > { %p2267_p5 = por %p2638_p3, %p41_p8  ;;  %s1518_s17 = sshll.u32 %s2272_s15, 3 }
  0x64   : > { %s2279_s22 = scalar_lea.hbm %s2617_s0, %s1519_s16  ;;  %s277_s23 = scalar_lea.vmem [#allocation3], %s1518_s17 }
  0x65   : > { %s2639_s20 = scalar_select %p2267_p5, 1, 0 }
  0x66   : > { %s284_s11 = sshll.u32 %s277_s23, 4  ;;  %p2281_p11 = pnand %p1737_p6, %p43_p10  ;;  %s2285_s11 = int_to_ptr.vmem [resolvable:$true] %s284_s11 }
  0x67   : > { %s291_s29 = sand.u32 1, %s2067_s27   ;;  %s274_s10 = scalar_lea.sflag [#allocation4], %s2272_s15 }
  0x68   : > { %s1929_s13 = scalar_lea.hbm %s2279_s22, 128  ;;  %p1931_p9 = pneg %p2281_p11 }
  0x69   : > { %p1930_p7 = scmp.ne.s32.totalorder %s2279_s22, %s1929_s13  ;;  %s1934_s16 = scalar_lea.hbm %s2617_s0, 256 }
  0x6a   : > { %p1935_p2 = scmp.lt.u32.totalorder %s2279_s22, %s2617_s0  ;;  %p1936_p1 = scmp.lt.u32.totalorder %s1934_s16, %s1929_s13 }
  0x6b   : > { %p1932_p12 = pnand %p1931_p9, %p1930_p7  ;;  %p1938_p8 = scmp.lt.u32.totalorder %s1929_s13, %s2279_s22 }
  0x6c   : > { %p1937_p4 = por %p1936_p1, %p1935_p2 }
  0x6d   : > { %p1933_p0 = pneg %p1932_p12 }
  0x6e   : > { %p1939_p13 = por %p1938_p8, %p1937_p4 }
  0x70   : > { %p1940_p6 = pnand %p1939_p13, %p1933_p0 }
  0x72   : > { %1943 = shalt.err (!%p1940_p6)
}
  0x73   : > { %s1944_s21 = scalar_lea.vmem %s2285_s11, 128  ;;  %s2076_s23 = smov [#allocation3]  }
  0x74   : > { %p1945_p10 = scmp.ne.s32.totalorder %s2285_s11, %s1944_s21  ;;  %s1949_s3 = sshll.u32 %s2076_s23, 4  ;;  %s1950_s3 = int_to_ptr.vmem [resolvable:$false] %s1949_s3 }
  0x75   : > { %s1951_s8 = scalar_lea.vmem %s1950_s3, 256  ;;  %p1952_p12 = scmp.lt.s32.totalorder %s2285_s11, %s1950_s3 }
  0x76   : > { %p1947_p3 = pnand %p1945_p10, %p1931_p9  ;;  %p1953_p2 = scmp.lt.s32.totalorder %s1951_s8, %s1944_s21 }
  0x78   : > { %p1948_p7 = pneg %p1947_p3  ;;  %p1954_p1 = por %p1953_p2, %p1952_p12 }
  0x7a   : > { %p1955_p4 = pnand %p1954_p1, %p1948_p7 }
  0x7c   : > { %1958 = shalt.err (!%p1955_p4)
}
  0x7d   : > { %1726 = dma.hbm_to_vmem [thread:$0]  (!%p2281_p11), %s2279_s22, 128, %s2285_s11, %s274_s10  }
  0x7e   : > { %s1520_s13 = sshll.u32 %s2067_s27, 4  ;;  %s294_s21 = scalar_lea.vmem [#allocation6], %s2272_s15 }
  0x7f   : > { %s2318_s19 = scalar_lea.hbm %s2618_s1, %s1520_s13  ;;  %s301_s23 = sshll.u32 %s294_s21, 4  ;;  %s302_s23 = int_to_ptr.vmem [resolvable:$true] %s301_s23 }
  0x80   : > { %s292_s3 = scalar_lea.sflag [#allocation7], %s291_s29  ;;  %s1959_s8 = scalar_lea.hbm %s2318_s19, 16 }
  0x81   : > { %p1960_p0 = scmp.ne.s32.totalorder %s2318_s19, %s1959_s8  ;;  %s1964_s10 = scalar_lea.hbm %s2618_s1, 32 }
  0x82   : > { %p1965_p6 = scmp.lt.u32.totalorder %s2318_s19, %s2618_s1  ;;  %p1966_p10 = scmp.lt.u32.totalorder %s1964_s10, %s1959_s8 }
  0x83   : > { %p1962_p8 = pnand %p1960_p0, %p1931_p9  ;;  %p1968_p7 = scmp.lt.u32.totalorder %s1959_s8, %s2318_s19 }
  0x84   : > { %p1967_p3 = por %p1966_p10, %p1965_p6 }
  0x85   : > { %p1963_p13 = pneg %p1962_p8 }
  0x86   : > { %p1969_p12 = por %p1968_p7, %p1967_p3 }
  0x88   : > { %p1970_p2 = pnand %p1969_p12, %p1963_p13 }
  0x8a   : > { %1973 = shalt.err (!%p1970_p2)
}
  0x8b   : > { %s1974_s15 = scalar_lea.vmem %s302_s23, 16  ;;  %s2077_s29 = smov [#allocation6]  }
  0x8c   : > { %p1975_p1 = scmp.ne.s32.totalorder %s302_s23, %s1974_s15  ;;  %s1979_s17 = sshll.u32 %s2077_s29, 4  ;;  %s1980_s17 = int_to_ptr.vmem [resolvable:$false] %s1979_s17 }
  0x8d   : > { %s1981_s21 = scalar_lea.vmem %s1980_s17, 32  ;;  %p1982_p8 = scmp.lt.s32.totalorder %s302_s23, %s1980_s17 }
  0x8e   : > { %p1977_p4 = pnand %p1975_p1, %p1931_p9  ;;  %p1983_p5 = scmp.lt.s32.totalorder %s1981_s21, %s1974_s15 }
  0x90   : > { %p1978_p0 = pneg %p1977_p4  ;;  %p1984_p6 = por %p1983_p5, %p1982_p8 }
  0x92   : > { %p1985_p10 = pnand %p1984_p6, %p1978_p0 }
  0x94   : > { %1988 = shalt.err (!%p1985_p10)
}
  0x95   : > { %1729 = dma.hbm_to_vmem [thread:$0]  (!%p2281_p11), %s2318_s19, 16, %s302_s23, %s292_s3  }
  0x96   : > { %p2641_p13 = scmp.ne.s32.totalorder %s2634_s9, 0 }
  0x97   : > { %s2345_s8 = sand.u32 (!%p2641_p13), 1, %s2059_s25   ;;  %p2642_p5 = scmp.ne.s32.totalorder (!%p2641_p13), %s2631_s30, 0 }
  0x98   : > { %317 = sbr.rel (%p2641_p13) target bundleno = 1916 (0x77c), region = 48  ;;  %s1522_s22 = sshll.u32 (!%p2641_p13), %s2345_s8, 3 }
  0x99   : > { %s320_s11 = scalar_lea.sflag (!%p2641_p13), [#allocation4], %s2345_s8  ;;  %s2351_s10 = scalar_lea.vmem (!%p2641_p13), [#allocation3], %s1522_s22 }
  0x9f   : > { %2034 = dma.done.wait (%p2642_p5), %s320_s11, 128  }
  0xa0   : > { %2036 = vsyncadd (%p2642_p5), %s320_s11, 4294967168  ;;  %s328_s9 = sand.u32 1, %s2146_s28   ;;  %s331_s19 = scalar_lea.vmem [#allocation6], %s2345_s8 }
  0xa1   : > { %s329_s14 = scalar_lea.sflag [#allocation7], %s328_s9 }
  0xa2   : > { %2038 = dma.done.wait (%p2642_p5), %s329_s14, 16  }
  0xa3   : > { %2040 = vsyncadd (%p2642_p5), %s329_s14, 4294967280  ;;  %p2643_p11 = scmp.eq.s32.totalorder %s2146_s28, 0 }
  0xa5   : > { %2042 = dma.done.wait (%p2643_p11), [#allocation7], 3072   ;;  %p2644_p9 = pmov %p2643_p11 }
  0xa7   : > { %2044 = vsyncadd (%p2644_p9), [#allocation7], 4294964224  ;;  %p2645_p3 = pmov %p2644_p9 }
  0xa9   : > { %2046 = dma.done.wait (%p2645_p3), [#allocation10], 1040   ;;  %p2646_p7 = pmov %p2645_p3 }
  0xaa   : > { %v2078_v0 = vmov 0   ;;  %v2079_v1 = vmov 0.0   ;;  %v1789_v2 = vld [vmem:[#allocation8 + $0x4] ss:$12 sps:$4 sm:$0xff]   ;;  %v1791_v3 = vld [vmem:[#allocation8] ss:$12 sps:$4 sm:$0xff]   ;;  %v683_v35 = vlaneseq }
  0xab   : > { %2048 = vsyncadd (%p2646_p7), [#allocation10], 4294966256  ;;  %581 = vmatprep.mubr.bf16.mxu0 %v2078_v0  ;;  %1607 = vmatprep.subr.bf16.mxu1 %v2079_v1  ;;  %v1792_v4 = vld [vmem:[#allocation8 + $0x1c] ss:$12 sps:$4 sm:$0xff]   ;;  %v1794_v5 = vld [vmem:[#allocation8 + $0x18] ss:$12 sps:$4 sm:$0xff]  }
  0xac   : > { %1787 = vset.pattern.permute.xlu1 %v2078_v0  ;;  %1788 = vset.pattern.permute.xlu0 %v2078_v0  ;;  %v1795_v6 = vld [vmem:[#allocation8 + $0x34] ss:$12 sps:$4 sm:$0xff]   ;;  %v1797_v7 = vld [vmem:[#allocation8 + $0x30] ss:$12 sps:$4 sm:$0xff]   ;;  %v1798_v8 = vld [vmem:[#allocation8 + $0x4c] ss:$12 sps:$4 sm:$0xff]  }
  0xad   : > { %549 = vmatprep.subr.bf16.mxu0 %v1789_v2  ;;  %v1800_v9 = vld [vmem:[#allocation8 + $0x48] ss:$12 sps:$4 sm:$0xff]   ;;  %v1801_v11 = vld [vmem:[#allocation8 + $0x64] ss:$12 sps:$4 sm:$0xff]   ;;  %v1814_v12 = vld [vmem:[#allocation8 + $0x20] ss:$12 sps:$4 sm:$0xff]  }
  0xae   : > { %550 = vmatpush1.bf16.msra.mxu0 %v1791_v3  ;;  %v1813_v10 = vld [vmem:[#allocation8 + $0x8] ss:$12 sps:$4 sm:$0xff]   ;;  %v1803_v13 = vld [vmem:[#allocation8 + $0x60] ss:$12 sps:$4 sm:$0xff]   ;;  %v1806_v15 = vld [vmem:[#allocation8 + $0x78] ss:$12 sps:$4 sm:$0xff]  }
  0xaf   : > { %551 = vmatprep.subr.bf16.mxu0 %v1792_v4  ;;  %1608 = vmatpush3.bf16.msra.mxu1 %v1813_v10  ;;  %v1804_v14 = vld [vmem:[#allocation8 + $0x7c] ss:$12 sps:$4 sm:$0xff]   ;;  %v1815_v16 = vld [vmem:[#allocation8 + $0x38] ss:$12 sps:$4 sm:$0xff]   ;;  %v1807_v17 = vld [vmem:[#allocation8 + $0x94] ss:$12 sps:$4 sm:$0xff]  }
  0xb0   : > { %1609 = vmatprep.subr.bf16.mxu1 %v2079_v1  ;;  %v1816_v18 = vld [vmem:[#allocation8 + $0x50] ss:$12 sps:$4 sm:$0xff]   ;;  %v1810_v20 = vld [vmem:[#allocation8 + $0xac] ss:$12 sps:$4 sm:$0xff]   ;;  %v1817_v21 = vld [vmem:[#allocation8 + $0x68] ss:$12 sps:$4 sm:$0xff]  }
  0xb1   : > { %v1809_v19 = vld [vmem:[#allocation8 + $0x90] ss:$12 sps:$4 sm:$0xff]   ;;  %v1812_v22 = vld [vmem:[#allocation8 + $0xa8] ss:$12 sps:$4 sm:$0xff]   ;;  %v1818_v24 = vld [vmem:[#allocation8 + $0x80] ss:$12 sps:$4 sm:$0xff]  }
  0xb2   : > { %552 = vmatpush1.bf16.msra.mxu0 %v1794_v5  ;;  %v387_v23 = vld [vmem:[%s2351_s10] sm:$0xff]  ;;  %vm2080_vm0 = vmmov 0   ;;  %vm635_vm1 = vcmask 261120   ;;  %s2081_s30 = smov 96   ;;  %s2082_s23 = smov 64   ;;  %v2406_v36 = vshrl.u32 %v683_v35, 7 }
  0xb3   : > { %553 = vmatprep.subr.bf16.mxu0 %v1795_v6  ;;  %1610 = vmatpush3.bf16.msra.mxu1 %v1814_v12  ;;  %v388_v25 = vpack.c.bf16 %v387_v23, %v387_v23  ;;  %v1819_v26 = vld [vmem:[#allocation8 + $0x98] ss:$12 sps:$4 sm:$0xff]   ;;  %v1820_v27 = vld [vmem:[#allocation8 + $0xb0] ss:$12 sps:$4 sm:$0xff]   ;;  %s2083_s3 = smov 32   ;;  %vm703_vm2 = vcmask 1043456  }
  0xb4   : > { %1611 = vmatprep.subr.bf16.mxu1 %v2079_v1  ;;  %1623 = vmatprep.mubr.msk.bf16.mxu1 %vm2080_vm0, %v2079_v1  ;;  %v685_v38 = vsub.s32 0, %v2406_v36  ;;  %v1119_v39 = vsub.s32 2, %v2406_v36  ;;  %v1127_v40 = vsub.s32 3, %v2406_v36  ;;  %v1135_v41 = vsub.s32 4, %v2406_v36  ;;  %v2421_v44 = vld [vmem:[%s2623_s6 + $0x8] sm:$0xff]  ;;  %v1105_v45 = vld [vmem:[%s2623_s6 + $0x10] sm:$0xff] }
  0xb5   : > { %v1143_v46 = vsub.s32 5, %v2406_v36  ;;  %v1151_v47 = vsub.s32 6, %v2406_v36  ;;  %v1175_v48 = vsub.s32 1, %v2406_v36  ;;  %vm689_vm5 = vcmask 64512   ;;  %p382_p12 = scmp.lt.s32.totalorder %s2146_s28, 1  ;;  %s1570_s14 = sshll.u32 %s2146_s28, 7 }
  0xb6   : > { %554 = vmatpush1.bf16.msra.mxu0 %v1797_v7  ;;  %v1120_v50 = vrot.slane %v2421_v44, %v1119_v39  ;;  %v1128_v51 = vrot.slane %v2421_v44, %v1127_v40  ;;  %v1136_v52 = vrot.slane %v2421_v44, %v1135_v41  ;;  %v1168_v53 = vrot.slane %v1105_v45, %v685_v38  ;;  %s2573_s13 = scalar_lea.hbm %s2624_s7, %s1570_s14  ;;  %p2647_p1 = scmp.ne.s32.totalorder %s2639_s20, 0 }
  0xb7   : > { %555 = vmatprep.subr.bf16.mxu0 %v1798_v8  ;;  %1612 = vmatpush3.bf16.msra.mxu1 %v1815_v16  ;;  %v1144_v56 = vrot.slane %v2421_v44, %v1143_v46  ;;  %v1152_v57 = vrot.slane %v2421_v44, %v1151_v47  ;;  %v1176_v58 = vrot.slane %v1105_v45, %v1175_v48  ;;  %vm868_vm6 = vcmask 523520   ;;  %s383_s17 = scalar_select %p382_p12, %s2146_s28, 1 }
  0xb8   : > { %1613 = vmatprep.subr.bf16.mxu1 %v2079_v1  ;;  %v1187_v4 = vrot.slane %v1105_v45, %v1119_v39  ;;  %v1198_v5 = vrot.slane %v1105_v45, %v1127_v40  ;;  %v1209_v6 = vrot.slane %v1105_v45, %v1135_v41  ;;  %v1220_v7 = vrot.slane %v1105_v45, %v1143_v46  ;;  %s1369_s28 = scalar_lea.sflag [#allocation5], %s2345_s8  ;;  %s2084_s16 = smov [#allocation12]  }
  0xb9   : > { %v1231_v8 = vrot.slane %v1105_v45, %v1151_v47  ;;  %vm985_vm7 = vcmask 785920   ;;  %vm1102_vm8 = vcmask 1048320   ;;  %s1527_s21 = sshll.u32 %s383_s17, 3  ;;  %s1993_s15 = sshll.u32 %s2084_s16, 4  ;;  %s1994_s15 = int_to_ptr.vmem [resolvable:$false] %s1993_s15 }
  0xba   : > { %556 = vmatpush1.bf16.msra.mxu0 %v1800_v9  ;;  %s385_s9 = scalar_lea.vmem %s2619_s2, %s1527_s21  ;;  %s1995_s29 = scalar_lea.vmem %s1994_s15, 256 }
  0xbb   : > { %557 = vmatprep.subr.bf16.mxu0 %v1801_v11  ;;  %1614 = vmatpush3.bf16.msra.mxu1 %v1816_v18 }
  0xbc   : > { %1615 = vmatprep.subr.bf16.mxu1 %v2079_v1 }
  0xbe   : > { %558 = vmatpush1.bf16.msra.mxu0 %v1803_v13 }
  0xbf   : > { %559 = vmatprep.subr.bf16.mxu0 %v1804_v14  ;;  %1616 = vmatpush3.bf16.msra.mxu1 %v1817_v21 }
  0xc0   : > { %1617 = vmatprep.subr.bf16.mxu1 %v2079_v1 }
  0xc2   : > { %560 = vmatpush1.bf16.msra.mxu0 %v1806_v15  ;;  %v1159_v15 = vsub.s32 7, %v2406_v36 }
  0xc3   : > { %561 = vmatprep.subr.bf16.mxu0 %v1807_v17  ;;  %1618 = vmatpush3.bf16.msra.mxu1 %v1818_v24 }
  0xc4   : > { %1619 = vmatprep.subr.bf16.mxu1 %v2079_v1  ;;  %v1160_v16 = vrot.slane %v2421_v44, %v1159_v15 }
  0xc6   : > { %562 = vmatpush1.bf16.msra.mxu0 %v1809_v19 }
  0xc7   : > { %563 = vmatprep.subr.bf16.mxu0 %v1810_v20  ;;  %1620 = vmatpush3.bf16.msra.mxu1 %v1819_v26 }
  0xc8   : > { %1621 = vmatprep.subr.bf16.mxu1 %v2079_v1 }
  0xca   : > { %564 = vmatpush1.bf16.msra.mxu0 %v1812_v22 }
  0xcb   : > { %1651 = vmatprep.subr.bf16.mxu0 %v2079_v1  ;;  %1622 = vmatpush3.bf16.msra.mxu1 %v1820_v27 }
  0xcc   : > { %1627 = vmatprep.subr.bf16.mxu1 %v2079_v1 }
  0xcd   : > { %582 = vmatmul.mubr.bf16.vlgmr.msra.gmra.mrb[0].mxu0 %v388_v25 }
  0xce   : > { %1653 = vmatprep.mubr.msk.bf16.mxu0 %vm2080_vm0, %v2079_v1  ;;  %1624 = vmatmul.mubr.bf16.vlgmr.msra.gmra.mrb[0].mxu1 %v388_v25  ;;  %v633_v25 = vld [vmem:[%s331_s19] sm:$0x1]  ;;  %s381_s19 = scalar_lea.vmem [#allocation12], %s1522_s22 }
  0xcf   : > { %1629 = vmatprep.mubr.msk.bf16.mxu1 %vm2080_vm0, %v2079_v1  ;;  %vm634_vm3 = vcmp.gt.f32.partialorder %v633_v25, 0.0 }
  0xd0   : > { %v682_v26 = vsel %vm634_vm3, 1, %v2078_v0 }
  0xd1   : > { %v686_v27 = vrot.slane %v682_v26, %v685_v38 }
  0xd3   : > { %vm687_vm4 = vcmp.eq.s32.totalorder %v686_v27, 1 }
 0x1a0   : > { %v583_v28 = vpop.f32.mrb[0].mxu0 }
 0x1a1   : > { %v630_v29 = vpack.c.bf16 %v583_v28, %v583_v28  ;;  %v585_v30 = vpop.f32.mrb[1].mxu0  ;;  %v2408_v37 = vpop.f32.mrb[0].mxu1 }
 0x1a2   : > { %v2391_v31 = vpack.c.bf16 %v585_v30, %v585_v30  ;;  %v587_v32 = vpop.f32.mrb[2].mxu0  ;;  %v1625_v42 = vpop.f32.mrb[1].mxu1  ;;  %v2416_v43 = vpack.c.bf16 %v2408_v37, %v2408_v37  ;;  %v2437_v59 = vmul.f32 %v1120_v50, %v2408_v37  ;;  %v2440_v60 = vmul.f32 %v1128_v51, %v2408_v37 }
 0x1a3   : > { %751 = vrot.lane.b32.xlu1 %v630_v29, %s2081_s30  ;;  %v588_v33 = vpop.f32.mrb[3].mxu0  ;;  %v627_v49 = vpop.f32.mrb[2].mxu1  ;;  %v2443_v61 = vmul.f32 %v1136_v52, %v2408_v37  ;;  %v2446_v62 = vmul.f32 %v1168_v53, %v2408_v37  ;;  %v2449_v63 = vmul.f32 %v1144_v56, %v2408_v37  ;;  %v2452_v2 = vmul.f32 %v1152_v57, %v2408_v37 }
 0x1a4   : > { %v640_v34 = vsel %vm635_vm1, %v2391_v31, 0  ;;  %v1626_v54 = vpop.f32.mrb[3].mxu1  ;;  %v705_v55 = vsel %vm703_vm2, %v2416_v43, 0  ;;  %v2455_v3 = vmul.f32 %v1176_v58, %v2408_v37  ;;  %v2459_v9 = vmul.f32 %v1187_v4, %v2408_v37 }
 0x1a5   : > { %1628 = vmatpush3.bf16.xpose.msra.mxu1 %v640_v34  ;;  %v2462_v10 = vmul.f32 %v1105_v45, %v2408_v37  ;;  %v2465_v11 = vmul.f32 %v1198_v5, %v2408_v37  ;;  %v2468_v12 = vmul.f32 %v1209_v6, %v2408_v37  ;;  %v2471_v13 = vmul.f32 %v1220_v7, %v2408_v37 }
 0x1a6   : > { %1633 = vmatprep.subr.bf16.mxu1 %v2079_v1  ;;  %v2474_v14 = vmul.f32 %v1231_v8, %v2408_v37  ;;  %v2479_v17 = vmul.f32 %v1160_v16, %v2408_v37 }
 0x1a7   : > { %872 = vrot.lane.b32.xlu1 %v2391_v31, %s2082_s23 }
 0x1ab   : > { %870 = vrot.lane.b32.xlu1 %v630_v29, %s2082_s23 }
 0x1ac   : > { %1630 = vmatmul.mubr.msk.bf16.vlgmr.msra.gmra.mrb[4].mxu1 %vm635_vm1, %v630_v29 }
 0x1ad   : > { %1635 = vmatprep.mubr.msk.bf16.mxu1 %vm2080_vm0, %v2079_v1  ;;  %1634 = vmatpush3.bf16.msra.mxu1 %v705_v55 }
 0x1ae   : > { %1639 = vmatprep.subr.bf16.mxu1 %v2079_v1 }
 0x1af   : > { %989 = vrot.lane.b32.xlu1 %v2391_v31, %s2083_s3 }
 0x1b3   : > { %987 = vrot.lane.b32.xlu1 %v630_v29, %s2083_s3 }
 0x215   : > { %v752_v18 = vpop.permute.xlu1 %751 }
 0x219   : > { %v873_v19 = vpop.permute.xlu1 %872 }
 0x21a   : > { %v878_v20 = vsel %vm635_vm1, %v873_v19, 0 }
 0x21b   : > { %1652 = vmatpush3.bf16.xpose.msra.mxu0 %v878_v20 }
 0x21c   : > { %1663 = vmatprep.subr.bf16.mxu0 %v2079_v1 }
 0x21d   : > { %v871_v21 = vpop.permute.xlu1 %870 }
 0x221   : > { %v990_v22 = vpop.permute.xlu1 %989 }
 0x222   : > { %v995_v23 = vsel %vm635_vm1, %v990_v22, 0  ;;  %1654 = vmatmul.mubr.msk.bf16.vlgmr.msra.gmra.mrb[4].mxu0 %vm635_vm1, %v871_v21 }
 0x223   : > { %1664 = vmatpush3.bf16.xpose.msra.mxu0 %v995_v23  ;;  %1665 = vmatprep.mubr.msk.bf16.mxu0 %vm2080_vm0, %v2079_v1 }
 0x224   : > { %1675 = vmatprep.subr.bf16.mxu0 %v2079_v1 }
 0x225   : > { %v988_v24 = vpop.permute.xlu1 %987 }
 0x22a   : > { %1666 = vmatmul.mubr.msk.bf16.vlgmr.msra.gmra.mrb[8].mxu0 %vm635_vm1, %v988_v24 }
 0x22b   : > { %1691 = vmatprep.mubr.msk.bf16.mxu0 %vm2080_vm0, %v2079_v1 }
 0x27f   : > { %v676_v28 = vpop.f32.mrb[4].mxu1 }
 0x280   : > { %v688_v29 = vsel %vm687_vm4, %v676_v28, -3.4028235e+38  ;;  %v1631_v30 = vpop.f32.mrb[5].mxu1 }
 0x281   : > { %v679_v32 = vpop.f32.mrb[6].mxu1  ;;  %v690_v33 = vsel %vm689_vm5, %v688_v29, -inf }
 0x282   : > { %691 = vmax.xlane.f32.xlu0 %v690_v33  ;;  %v1632_v34 = vpop.f32.mrb[7].mxu1 }
 0x298   : > { %754 = vrot.lane.b32.xlu0 %v2391_v31, %s2081_s30 }
 0x2f5   : > { %v914_v35 = vpop.f32.mrb[4].mxu0 }
 0x2f6   : > { %v920_v36 = vsel %vm687_vm4, %v914_v35, -3.4028235e+38  ;;  %v1655_v39 = vpop.f32.mrb[5].mxu0 }
 0x2f7   : > { %v917_v40 = vpop.f32.mrb[6].mxu0  ;;  %v921_v38 = vsel %vm689_vm5, %v920_v36, -inf }
 0x2f8   : > { %922 = vmax.xlane.f32.xlu0 %v921_v38  ;;  %v1656_v41 = vpop.f32.mrb[7].mxu0 }
 0x2fd   : > { %v1031_v42 = vpop.f32.mrb[8].mxu0 }
 0x2fe   : > { %v1037_v45 = vsel %vm687_vm4, %v1031_v42, -3.4028235e+38  ;;  %v1667_v46 = vpop.f32.mrb[9].mxu0 }
 0x2ff   : > { %v1034_v47 = vpop.f32.mrb[10].mxu0  ;;  %v1038_v48 = vsel %vm689_vm5, %v1037_v45, -inf }
 0x300   : > { %1039 = vmax.xlane.f32.xlu1 %v1038_v48  ;;  %v1668_v49 = vpop.f32.mrb[11].mxu0 }
 0x30e   : > { %814 = vrot.lane.b32.xlu0 %v2416_v43, %s2081_s30 }
 0x30f   : > { %v692_v31 = vpop.xlane.xlu0 %691 }
 0x310   : > { %v693_v50 = vsub.f32 %v688_v29, %v692_v31 }
 0x312   : > { %v694_v51 = vmul.f32 1.442695, %v693_v50 }
 0x313   : > { %v755_v53 = vpop.permute.xlu0 %754 }
 0x314   : > { %1829 = vpow2.f32 %v694_v51  ;;  %v760_v55 = vsel %vm635_vm1, %v755_v53, 0 }
 0x31e   : > { %v1830_v52 = vpop.eup %1829 }
 0x31f   : > { %v699_v54 = vpack.c.bf16 %v1830_v52, %v1830_v52  ;;  %v696_v38 = vsel %vm689_vm5, %v1830_v52, 0.0 }
 0x321   : > { %1636 = vmatmul.mubr.msk.bf16.vlgmr.msra.gmra.mrb[8].mxu1 %vm689_vm5, %v699_v54 }
 0x322   : > { %1640 = vmatpush3.bf16.xpose.msra.mxu1 %v760_v55  ;;  %1641 = vmatprep.mubr.msk.bf16.mxu1 %vm2080_vm0, %v2079_v1 }
 0x323   : > { %1645 = vmatprep.subr.bf16.mxu1 %v2079_v1 }
 0x329   : > { %1642 = vmatmul.mubr.msk.bf16.vlgmr.msra.gmra.mrb[12].mxu1 %vm635_vm1, %v752_v18 }
 0x32a   : > { %1647 = vmatprep.mubr.msk.bf16.mxu1 %vm2080_vm0, %v2079_v1 }
 0x385   : > { %v923_v56 = vpop.xlane.xlu0 %922 }
 0x386   : > { %v924_v21 = vsub.f32 %v920_v36, %v923_v56 }
 0x388   : > { %v925_v22 = vmul.f32 1.442695, %v924_v21  ;;  %v1821_v21 = vld [vmem:[#allocation9] sm:$0xff]  }
 0x389   : > { %v815_v57 = vpop.permute.xlu0 %814  ;;  %1676 = vmatpush3.bf16.msra.mxu0 %v1821_v21 }
 0x38a   : > { %v820_v58 = vsel %vm703_vm2, %v815_v57, 0  ;;  %1831 = vpow2.f32 %v925_v22  ;;  %v1822_v22 = vld [vmem:[#allocation9 + $0x8] sm:$0xff]   ;;  %1677 = vmatprep.subr.bf16.mxu0 %v2079_v1 }
 0x38b   : > { %1646 = vmatpush3.bf16.msra.mxu1 %v820_v58 }
 0x38c   : > { %1657 = vmatprep.subr.bf16.mxu1 %v2079_v1 }
 0x38d   : > { %v1040_v25 = vpop.xlane.xlu1 %1039  ;;  %1678 = vmatpush3.bf16.msra.mxu0 %v1822_v22 }
 0x38e   : > { %v1041_v26 = vsub.f32 %v1037_v45, %v1040_v25  ;;  %1679 = vmatprep.subr.bf16.mxu0 %v2079_v1  ;;  %v1825_v25 = vld [vmem:[#allocation9 + $0x20] sm:$0xff]  }
 0x390   : > { %v1042_v29 = vmul.f32 1.442695, %v1041_v26  ;;  %v1826_v26 = vld [vmem:[#allocation9 + $0x28] sm:$0xff]  }
 0x394   : > { %v1832_v23 = vpop.eup %1831 }
 0x395   : > { %v927_v24 = vsel %vm689_vm5, %v1832_v23, 0.0  ;;  %v930_v41 = vpack.c.bf16 %v1832_v23, %v1832_v23  ;;  %v1823_v23 = vld [vmem:[#allocation9 + $0x10] sm:$0xff]  }
 0x396   : > { %1680 = vmatpush3.bf16.msra.mxu0 %v1823_v23 }
 0x397   : > { %1681 = vmatprep.subr.bf16.mxu0 %v2079_v1 }
 0x3f4   : > { %v741_v4 = vpop.f32.mrb[8].mxu1 }
 0x3f5   : > { %v1637_v5 = vpop.f32.mrb[9].mxu1 }
 0x3f6   : > { %v744_v6 = vpop.f32.mrb[10].mxu1 }
 0x3f7   : > { %v1638_v7 = vpop.f32.mrb[11].mxu1 }
 0x3fc   : > { %v796_v8 = vpop.f32.mrb[12].mxu1 }
 0x3fd   : > { %v802_v15 = vsel %vm687_vm4, %v796_v8, -3.4028235e+38  ;;  %v1643_v16 = vpop.f32.mrb[13].mxu1 }
 0x3fe   : > { %v799_v19 = vpop.f32.mrb[14].mxu1  ;;  %v803_v18 = vsel %vm689_vm5, %v802_v15, -inf }
 0x3ff   : > { %v1644_v20 = vpop.f32.mrb[15].mxu1  ;;  %804 = vmax.xlane.f32.xlu1 %v803_v18 }
 0x410   : > { %931 = vrot.lane.b32.xlu1 %v2416_v43, %s2082_s23 }
 0x414   : > { %1048 = vrot.lane.b32.xlu1 %v2416_v43, %s2083_s3 }
 0x438   : > { %928 = vadd.xlane.f32.xlu1 %v927_v24  ;;  %v1824_v24 = vld [vmem:[#allocation9 + $0x18] sm:$0xff]  }
 0x439   : > { %1682 = vmatpush3.bf16.msra.mxu0 %v1824_v24 }
 0x43a   : > { %1683 = vmatprep.subr.bf16.mxu0 %v2079_v1 }
 0x43d   : > { %1684 = vmatpush3.bf16.msra.mxu0 %v1825_v25 }
 0x43e   : > { %1685 = vmatprep.subr.bf16.mxu0 %v2079_v1 }
 0x441   : > { %1686 = vmatpush3.bf16.msra.mxu0 %v1826_v26 }
 0x442   : > { %1687 = vmatprep.subr.bf16.mxu0 %v2079_v1 }
 0x48c   : > { %v805_v27 = vpop.xlane.xlu1 %804 }
 0x48d   : > { %v806_v28 = vsub.f32 %v802_v15, %v805_v27  ;;  %v1827_v27 = vld [vmem:[#allocation9 + $0x30] sm:$0xff]  }
 0x48e   : > { %1688 = vmatpush3.bf16.msra.mxu0 %v1827_v27 }
 0x48f   : > { %v807_v30 = vmul.f32 1.442695, %v806_v28  ;;  %v1828_v28 = vld [vmem:[#allocation9 + $0x38] sm:$0xff]   ;;  %1689 = vmatprep.subr.bf16.mxu0 %v2079_v1 }
 0x490   : > { %v932_v33 = vpop.permute.xlu1 %931 }
 0x491   : > { %1833 = vpow2.f32 %v807_v30  ;;  %v937_v36 = vsel %vm703_vm2, %v932_v33, 0 }
 0x492   : > { %1835 = vpow2.f32 %v1042_v29  ;;  %1690 = vmatpush3.bf16.msra.mxu0 %v1828_v28 }
 0x494   : > { %v1049_v40 = vpop.permute.xlu1 %1048 }
 0x495   : > { %v1054_v42 = vsel %vm703_vm2, %v1049_v40, 0 }
 0x49b   : > { %v1834_v32 = vpop.eup %1833 }
 0x49c   : > { %v809_v34 = vsel %vm689_vm5, %v1834_v32, 0.0  ;;  %v812_v43 = vpack.c.bf16 %v1834_v32, %v1834_v32  ;;  %v1836_v35 = vpop.eup %1835  ;;  %v1108_v32 = vrot.slane %v2408_v37, 7 }
 0x49d   : > { %810 = vadd.xlane.f32.xlu0 %v809_v34  ;;  %v1044_v39 = vsel %vm689_vm5, %v1836_v35, 0.0  ;;  %v1047_v45 = vpack.c.bf16 %v1836_v35, %v1836_v35 }
 0x49e   : > { %1648 = vmatmul.mubr.msk.bf16.vlgmr.msra.gmra.mrb[16].mxu1 %vm689_vm5, %v812_v43  ;;  %v1110_v34 = vmul.f32 %v1108_v32, %v2421_v44 }
 0x49f   : > { %1658 = vmatpush3.bf16.msra.mxu1 %v937_v36  ;;  %1659 = vmatprep.mubr.msk.bf16.mxu1 %vm2080_vm0, %v2079_v1 }
 0x4a0   : > { %1669 = vmatprep.subr.bf16.mxu1 %v2079_v1  ;;  %v1112_v43 = vrot.slane %v1110_v34, 1 }
 0x4a1   : > { %1045 = vadd.xlane.f32.xlu0 %v1044_v39 }
 0x4a5   : > { %697 = vadd.xlane.f32.xlu0 %v696_v38 }
 0x4a6   : > { %1660 = vmatmul.mubr.msk.bf16.vlgmr.msra.gmra.mrb[20].mxu1 %vm689_vm5, %v930_v41  ;;  %v1359_v41 = vld [vmem:[%s385_s9] sm:$0xff] }
 0x4a7   : > { %1670 = vmatpush3.bf16.msra.mxu1 %v1054_v42  ;;  %1671 = vmatprep.mubr.msk.bf16.mxu1 %vm2080_vm0, %v2079_v1  ;;  %vm1360_vm9 = vcmp.gt.f32.partialorder %v1359_v41, 0.0 }
 0x4ae   : > { %1672 = vmatmul.mubr.msk.bf16.vlgmr.msra.gmra.mrb[24].mxu1 %vm689_vm5, %v1047_v45 }
 0x4c5   : > { %v929_v50 = vpop.xlane.xlu1 %928 }
 0x52a   : > { %v811_v46 = vpop.xlane.xlu0 %810 }
 0x52e   : > { %v1046_v47 = vpop.xlane.xlu0 %1045 }
 0x532   : > { %v698_v48 = vpop.xlane.xlu0 %697 }
 0x533   : > { %1837 = vrcp.f32 %v698_v48 }
 0x534   : > { %1839 = vrcp.f32 %v811_v46 }
 0x535   : > { %1841 = vrcp.f32 %v929_v50 }
 0x536   : > { %1843 = vrcp.f32 %v1046_v47 }
 0x53d   : > { %v1838_v49 = vpop.eup %1837 }
 0x53e   : > { %v748_v31 = vmul.f32 %v1838_v49, %v741_v4  ;;  %v1840_v51 = vpop.eup %1839 }
 0x53f   : > { %v1842_v57 = vpop.eup %1841 }
 0x540   : > { %749 = vst.msk [vmem:[#allocation2] sm:$0xff] %vm635_vm1, %v748_v31  ;;  %v1844_v8 = vpop.eup %1843  ;;  %v1179_v31 = vrot.slane %v2455_v3, 1  ;;  %v1223_v3 = vrot.slane %v2471_v13, 5 }
 0x571   : > { %v856_v52 = vpop.f32.mrb[16].mxu1 }
 0x572   : > { %v863_v53 = vmul.f32 %v1840_v51, %v856_v52  ;;  %v1649_v54 = vpop.f32.mrb[17].mxu1 }
 0x573   : > { %v859_v55 = vpop.f32.mrb[18].mxu1 }
 0x574   : > { %v1650_v56 = vpop.f32.mrb[19].mxu1  ;;  %865 = vrot.lane.b32.xlu1 %v863_v53, %s2083_s3 }
 0x579   : > { %v973_v58 = vpop.f32.mrb[20].mxu1 }
 0x57a   : > { %v980_v5 = vmul.f32 %v1842_v57, %v973_v58  ;;  %v1661_v6 = vpop.f32.mrb[21].mxu1 }
 0x57b   : > { %v976_v7 = vpop.f32.mrb[22].mxu1 }
 0x57c   : > { %v1662_v4 = vpop.f32.mrb[23].mxu1  ;;  %982 = vrot.lane.b32.xlu0 %v980_v5, %s2082_s23 }
 0x581   : > { %v1090_v15 = vpop.f32.mrb[24].mxu1 }
 0x582   : > { %v1097_v16 = vmul.f32 %v1844_v8, %v1090_v15  ;;  %v1673_v19 = vpop.f32.mrb[25].mxu1  ;;  %v1568_v8 = vld [vmem:[#allocation11] ss:$0 sm:$0xff] }
 0x583   : > { %v1093_v18 = vpop.f32.mrb[26].mxu1 }
 0x584   : > { %1099 = vrot.lane.b32.xlu1 %v1097_v16, %s2081_s30  ;;  %v1674_v20 = vpop.f32.mrb[27].mxu1  ;;  %s1382_s30 = sshll.u32 %s381_s19, 4  ;;  %s2575_s30 = int_to_ptr.vmem [resolvable:$true] %s1382_s30 }
 0x585   : > { %s1989_s22 = scalar_lea.vmem %s2575_s30, 128  ;;  %p1996_p8 = scmp.lt.s32.totalorder %s2575_s30, %s1994_s15 }
 0x586   : > { %p1990_p2 = scmp.ne.s32.totalorder %s2575_s30, %s1989_s22  ;;  %p1997_p6 = scmp.lt.s32.totalorder %s1995_s29, %s1989_s22 }
 0x588   : > { %p1991_p4 = pnand %p1990_p2, %p2647_p1  ;;  %p1998_p10 = por %p1997_p6, %p1996_p8 }
 0x58a   : > { %p1992_p0 = pneg %p1991_p4 }
 0x58c   : > { %p1999_p13 = pnand %p1998_p10, %p1992_p0 }
 0x5e6   : > { %v866_v29 = vpop.permute.xlu1 %865 }
 0x5e7   : > { %869 = vst.msk [vmem:[#allocation2] sm:$0xff] %vm868_vm6, %v866_v29 }
 0x5ee   : > { %v983_v30 = vpop.permute.xlu0 %982 }
 0x5ef   : > { %986 = vst.msk [vmem:[#allocation2] sm:$0xff] %vm985_vm7, %v983_v30 }
 0x5f6   : > { %v1100_v33 = vpop.permute.xlu1 %1099 }
 0x5f7   : > { %1103 = vst.msk [vmem:[#allocation2] sm:$0xff] %vm1102_vm8, %v1100_v33 }
 0x5fe   : > { %v1106_v35 = vld [vmem:[#allocation2 + $0x7] sm:$0x1] }
 0x5ff   : > { %v1114_v36 = vadd.f32 %v1112_v43, %v1106_v35 }
 0x601   : > { %1115 = vst [vmem:[#allocation2 + $0x7] sm:$0x1] %v1114_v36 }
 0x608   : > { %v1116_v1 = vld [vmem:[#allocation2 + $0x6] sm:$0x3] }
 0x609   : > { %v1122_v39 = vadd.f32 %v2437_v59, %v1116_v1  ;;  %v1361_v59 = vsel %vm1360_vm9, 1, %v2078_v0 }
 0x60a   : > { %1363 = vperm.xlu1 %1787, %v1361_v59  }
 0x60b   : > { %1123 = vst [vmem:[#allocation2 + $0x6] sm:$0x3] %v1122_v39 }
 0x612   : > { %v1124_v40 = vld [vmem:[#allocation2 + $0x5] sm:$0x7] }
 0x613   : > { %v1130_v38 = vadd.f32 %v2440_v60, %v1124_v40 }
 0x615   : > { %1131 = vst [vmem:[#allocation2 + $0x5] sm:$0x7] %v1130_v38 }
 0x61c   : > { %v1132_v37 = vld [vmem:[#allocation2 + $0x4] sm:$0xf] }
 0x61d   : > { %v1138_v44 = vadd.f32 %v2443_v61, %v1132_v37 }
 0x61f   : > { %1139 = vst [vmem:[#allocation2 + $0x4] sm:$0xf] %v1138_v44 }
 0x626   : > { %v1140_v42 = vld [vmem:[#allocation2 + $0x3] sm:$0x1f] }
 0x627   : > { %v1146_v60 = vadd.f32 %v2449_v63, %v1140_v42  ;;  %v1190_v63 = vrot.slane %v2459_v9, 2  ;;  %v1234_v9 = vrot.slane %v2474_v14, 6 }
 0x629   : > { %1147 = vst [vmem:[#allocation2 + $0x3] sm:$0x1f] %v1146_v60 }
 0x630   : > { %v1148_v45 = vld [vmem:[#allocation2 + $0x2] sm:$0x3f] }
 0x631   : > { %v1154_v46 = vadd.f32 %v2452_v2, %v1148_v45  ;;  %v1201_v2 = vrot.slane %v2465_v11, 3  ;;  %v1241_v11 = vrot.slane %v2462_v10, 7 }
 0x633   : > { %1155 = vst [vmem:[#allocation2 + $0x2] sm:$0x3f] %v1154_v46 }
 0x63a   : > { %v1156_v47 = vld [vmem:[#allocation2 + $0x1] sm:$0x7f] }
 0x63b   : > { %v1162_v48 = vadd.f32 %v2479_v17, %v1156_v47  ;;  %v1212_v17 = vrot.slane %v2468_v12, 4 }
 0x63d   : > { %1163 = vst [vmem:[#allocation2 + $0x1] sm:$0x7f] %v1162_v48 }
 0x644   : > { %v1164_v49 = vld [vmem:[#allocation2] sm:$0xff] }
 0x645   : > { %v1170_v61 = vadd.f32 %v2446_v62, %v1164_v49 }
 0x647   : > { %1171 = vst [vmem:[#allocation2] sm:$0xff] %v1170_v61 }
 0x64e   : > { %v1172_v0 = vld [vmem:[#allocation2] sm:$0x7f] }
 0x64f   : > { %v1181_v50 = vadd.f32 %v1179_v31, %v1172_v0 }
 0x651   : > { %1182 = vst [vmem:[#allocation2] sm:$0x7f] %v1181_v50 }
 0x658   : > { %v1183_v51 = vld [vmem:[#allocation2] sm:$0x3f] }
 0x659   : > { %v1192_v52 = vadd.f32 %v1190_v63, %v1183_v51 }
 0x65b   : > { %1193 = vst [vmem:[#allocation2] sm:$0x3f] %v1192_v52 }
 0x662   : > { %v1194_v53 = vld [vmem:[#allocation2] sm:$0x1f] }
 0x663   : > { %v1203_v54 = vadd.f32 %v1201_v2, %v1194_v53 }
 0x665   : > { %1204 = vst [vmem:[#allocation2] sm:$0x1f] %v1203_v54 }
 0x66c   : > { %v1205_v55 = vld [vmem:[#allocation2] sm:$0xf] }
 0x66d   : > { %v1214_v62 = vadd.f32 %v1212_v17, %v1205_v55 }
 0x66f   : > { %1215 = vst [vmem:[#allocation2] sm:$0xf] %v1214_v62 }
 0x676   : > { %v1216_v56 = vld [vmem:[#allocation2] sm:$0x7] }
 0x677   : > { %v1225_v57 = vadd.f32 %v1223_v3, %v1216_v56 }
 0x679   : > { %1226 = vst [vmem:[#allocation2] sm:$0x7] %v1225_v57 }
 0x680   : > { %v1227_v58 = vld [vmem:[#allocation2] sm:$0x3] }
 0x681   : > { %v1236_v5 = vadd.f32 %v1234_v9, %v1227_v58 }
 0x683   : > { %1237 = vst [vmem:[#allocation2] sm:$0x3] %v1236_v5 }
 0x689   : > { %v1364_v13 = vpop.permute.xlu1 %1363 }
 0x68a   : > { %v1238_v6 = vld [vmem:[#allocation2] sm:$0x1]  ;;  %vm1365_vm10 = vcmp.eq.s32.totalorder %v1364_v13, 1 }
 0x68b   : > { %v1243_v7 = vadd.f32 %v1241_v11, %v1238_v6 }
 0x68d   : > { %1244 = vst [vmem:[#allocation2] sm:$0x1] %v1243_v7 }
 0x694   : > { %v1245_v12 = vld [vmem:[#allocation2] sm:$0xff] }
 0x695   : > { %v1246_v4 = vpack.c.bf16 %v1245_v12, %v1245_v12 }
 0x697   : > { %1692 = vmatmul.mubr.bf16.vlgmr.msra.gmra.mrb[12].mxu0 %v1246_v4 }
 0x76a   : > { %v1345_v14 = vpop.f32.mrb[12].mxu0 }
 0x76b   : > { %v1358_v15 = vadd.f32 %v1568_v8, %v1345_v14  ;;  %v1693_v16 = vpop.f32.mrb[13].mxu0 }
 0x76c   : > { %v1348_v19 = vpop.f32.mrb[14].mxu0 }
 0x76d   : > { %v1366_v10 = vsel %vm1365_vm10, %v1358_v15, 0.0  ;;  %v1694_v18 = vpop.f32.mrb[15].mxu0 }
 0x76e   : > { %1367 = vst [vmem:[%s381_s19] sm:$0xff] %v1366_v10 }
 0x76f   : > { %2002 = shalt.err (!%p1999_p13)
}
 0x770   : > { %s2003_s8 = scalar_lea.hbm %s2573_s13, 128  ;;  %s2007_s11 = scalar_lea.hbm %s2624_s7, 256 }
 0x771   : > { %p2004_p5 = scmp.ne.s32.totalorder %s2573_s13, %s2003_s8  ;;  %p2008_p3 = scmp.lt.u32.totalorder %s2573_s13, %s2624_s7 }
 0x772   : > { %p2009_p7 = scmp.lt.u32.totalorder %s2007_s11, %s2003_s8  ;;  %p2011_p2 = scmp.lt.u32.totalorder %s2003_s8, %s2573_s13 }
 0x773   : > { %p2005_p11 = pnand %p2004_p5, %p2647_p1 }
 0x774   : > { %p2010_p12 = por %p2009_p7, %p2008_p3 }
 0x775   : > { %p2006_p9 = pneg %p2005_p11 }
 0x776   : > { %p2012_p4 = por %p2011_p2, %p2010_p12 }
 0x778   : > { %p2013_p0 = pnand %p2012_p4, %p2006_p9 }
 0x77a   : > { %2016 = shalt.err (!%p2013_p0)
}
 0x77b   : > { %1711 = dma.vmem_to_hbm [thread:$0]  (%p2647_p1), %s2575_s30, 128, %s2573_s13, %s1369_s28  }
 0x77c PF: > { %s2648_s14 = sld [smem:[#allocation18_spill]]  ;;  %s1394_s19 = sand.u32 1, %s2055_s24  }
 0x77d   : > { %p2650_p6 = scmp.ge.s32.totalorder %s2067_s27, 2  ;;  %s1395_s23 = scalar_lea.sflag [#allocation5], %s1394_s19 }
 0x782   : > { %p2649_p8 = scmp.ne.s32.totalorder %s2648_s14, 0 }
 0x784   : > { %p1731_p10 = pnand %p2650_p6, %p2649_p8 }
 0x786   : > { %2050 = dma.done.wait (!%p1731_p10), %s1395_s23, 128  }
 0x787   : > { %2052 = vsyncadd (!%p1731_p10), %s1395_s23, 4294967168  ;;  %p24_p13 = scmp.ge.s32.totalorder %s2235_s18, 4   ;;  %s2651_s24 = smov %s2059_s25 }
 0x788   : > { %s2652_s25 = smov %s2063_s26  ;;  %s2653_s26 = smov %s2263_s12 }
 0x789   : > { %s2654_s27 = smov %s2235_s18  ;;  %26 = sbr.rel (!%p24_p13) target bundleno = 10 (0xa), region = 121 }
 0x790   :  { %1400 = vsyncpa [#allocation4], 1 }
 0x791   :  { %1402 = vsyncpa [#allocation4 + $0x1], 1 }
 0x792   :  { %1403 = vsyncpa [#allocation7], 1 }
 0x793   :  { %1405 = vsyncpa [#allocation7 + $0x1], 1 }
 0x794   :  { %1406 = vsyncpa [#allocation10], 1 }
 0x795   :  { %1407 = vsyncpa [#allocation5], 1 }
 0x796   :  { %1409 = vsyncpa [#allocation5 + $0x1], 1 }

</bundles_post_ra>
